<compile_context>
chip_gen: v5e
topology: v5e:2x2
jax: 0.10.0
libtpu: 0.0.40
codegen_flags: <defaults>
</compile_context>

<pallas_src>
import functools

import jax
import jax.numpy as jnp
from jax.experimental import pallas as pl
from jax.experimental.pallas import tpu as pltpu

# ----------------------------- model dims -----------------------------------
VOCAB = 128          # shared src / trg vocab size
D = 128              # hidden / embedding size
HEADS = 4
D_HEAD = D // HEADS
FF = 256
N_LAYERS = 2
UNK_IDX, PAD_IDX, BOS_IDX, EOS_IDX = 0, 1, 2, 3
LN_EPS = 1e-6        # joeynmt uses nn.LayerNorm(size, eps=1e-6)
VMEM_LIMIT = 32 * 1024 * 1024


# ----------------------------- in-kernel helpers ------------------------------
def _ln(x, g, b):
    """LayerNorm over the last (lane) dim. x: (rows, D), g/b: (1, D)."""
    mean = jnp.mean(x, axis=-1, keepdims=True)
    var = jnp.mean(jnp.square(x - mean), axis=-1, keepdims=True)
    return (x - mean) * jax.lax.rsqrt(var + LN_EPS) * g + b


def _mha_block(q, k, v, kmask, wo, *, causal):
    """Multi-head attention fully in-kernel.

    q: (Sq, D), k/v: (Sk, D), kmask: (1, Sk) float (1 = valid), wo: (D, D).
    Heads are split with static lane slices; the output projection is fused by
    summing ctx_h @ wo[h*Dh:(h+1)*Dh, :] (no lane concatenate needed).
    Returns (Sq, D) pre-bias attention output.
    """
    Sq = q.shape[0]
    Sk = k.shape[0]
    scale = 1.0 / (float(D_HEAD) ** 0.5)
    valid = kmask > 0.0                                   # (1, Sk) bool
    if causal:
        row = jax.lax.broadcasted_iota(jnp.int32, (Sq, Sk), 0)
        col = jax.lax.broadcasted_iota(jnp.int32, (Sq, Sk), 1)
        valid = jnp.logical_and(row >= col, valid)        # (Sq, Sk) bool

    out = None
    for h in range(HEADS):                                # static unroll, H=4
        sl = slice(h * D_HEAD, (h + 1) * D_HEAD)
        qh, kh, vh = q[:, sl], k[:, sl], v[:, sl]         # (S*, Dh)
        s = jax.lax.dot_general(                          # q @ k.T without transpose
            qh, kh, (((1,), (1,)), ((), ())),
            preferred_element_type=jnp.float32) * scale   # (Sq, Sk)
        s = jnp.where(valid, s, -1e9)
        s = s - jnp.max(s, axis=-1, keepdims=True)
        p = jnp.exp(s)
        p = p * pl.reciprocal(jnp.sum(p, axis=-1, keepdims=True), approx=True)
        ctx = jnp.dot(p, vh, preferred_element_type=jnp.float32)          # (Sq, Dh)
        part = jnp.dot(ctx, wo[sl, :], preferred_element_type=jnp.float32)  # (Sq, D)
        out = part if out is None else out + part
    return out


def _ffn(x, g, b, w1, b1, w2, b2):
    """joeynmt PositionwiseFeedForward: LN -> linear -> ReLU -> linear (+residual outside)."""
    xn = _ln(x, g, b)
    h = jnp.maximum(jnp.dot(xn, w1, preferred_element_type=jnp.float32) + b1, 0.0)
    return jnp.dot(h, w2, preferred_element_type=jnp.float32) + b2


# ----------------------------- fused layer kernels ----------------------------
def _encoder_layer_kernel(x_ref, kmask_ref,
                          ln_g_ref, ln_b_ref,
                          wqkv_ref, bqkv_ref, wo_ref, bo_ref,
                          ff_g_ref, ff_b_ref, w1_ref, b1_ref, w2_ref, b2_ref,
                          o_ref):
    x = x_ref[0].astype(jnp.float32)                      # (S, D)
    kmask = kmask_ref[0]                                  # (1, S)

    # pre-LN self attention (fused QKV)
    xn = _ln(x, ln_g_ref[...], ln_b_ref[...])
    qkv = jnp.dot(xn, wqkv_ref[...], preferred_element_type=jnp.float32) + bqkv_ref[...]
    attn = _mha_block(qkv[:, :D], qkv[:, D:2 * D], qkv[:, 2 * D:],
                      kmask, wo_ref[...], causal=False) + bo_ref[...]
    h = x + attn

    # position-wise feed forward + residual
    ff = _ffn(h, ff_g_ref[...], ff_b_ref[...],
              w1_ref[...], b1_ref[...], w2_ref[...], b2_ref[...])
    o_ref[0] = (h + ff).astype(o_ref.dtype)


def _decoder_layer_kernel(x_ref, enc_ref, tmask_ref, smask_ref,
                          ln1_g_ref, ln1_b_ref,
                          s_wqkv_ref, s_bqkv_ref, s_wo_ref, s_bo_ref,
                          ln2_g_ref, ln2_b_ref,
                          c_wq_ref, c_bq_ref, c_wkv_ref, c_bkv_ref, c_wo_ref, c_bo_ref,
                          ff_g_ref, ff_b_ref, w1_ref, b1_ref, w2_ref, b2_ref,
                          o_ref):
    x = x_ref[0].astype(jnp.float32)                      # (T, D)
    enc = enc_ref[0].astype(jnp.float32)                  # (S, D)
    tmask = tmask_ref[0]                                  # (1, T) target key mask
    smask = smask_ref[0]                                  # (1, S) source key mask

    # masked (causal) self attention
    xn = _ln(x, ln1_g_ref[...], ln1_b_ref[...])
    qkv = jnp.dot(xn, s_wqkv_ref[...], preferred_element_type=jnp.float32) + s_bqkv_ref[...]
    attn = _mha_block(qkv[:, :D], qkv[:, D:2 * D], qkv[:, 2 * D:],
                      tmask, s_wo_ref[...], causal=True) + s_bo_ref[...]
    h1 = x + attn

    # cross attention over encoder states (fused KV)
    h1n = _ln(h1, ln2_g_ref[...], ln2_b_ref[...])
    q = jnp.dot(h1n, c_wq_ref[...], preferred_element_type=jnp.float32) + c_bq_ref[...]
    kv = jnp.dot(enc, c_wkv_ref[...], preferred_element_type=jnp.float32) + c_bkv_ref[...]
    attn2 = _mha_block(q, kv[:, :D], kv[:, D:],
                       smask, c_wo_ref[...], causal=False) + c_bo_ref[...]
    h2 = h1 + attn2

    # position-wise feed forward + residual
    ff = _ffn(h2, ff_g_ref[...], ff_b_ref[...],
              w1_ref[...], b1_ref[...], w2_ref[...], b2_ref[...])
    o_ref[0] = (h2 + ff).astype(o_ref.dtype)


# ----------------------------- small fused kernels ----------------------------
def _layernorm_kernel(x_ref, g_ref, b_ref, o_ref):
    o_ref[0] = _ln(x_ref[0].astype(jnp.float32), g_ref[...], b_ref[...]).astype(o_ref.dtype)


def _final_logits_kernel(x_ref, g_ref, b_ref, w_ref, o_ref):
    """Final decoder LayerNorm fused with the output projection (bias=False)."""
    xn = _ln(x_ref[0].astype(jnp.float32), g_ref[...], b_ref[...])
    o_ref[0] = jnp.dot(xn, w_ref[...], preferred_element_type=jnp.float32).astype(o_ref.dtype)


def _xent_loss_kernel(logits_ref, trg_ref, o_ref, *, pad_index):
    """Fused log_softmax + NLL (sum reduction, ignore_index=pad). No one_hot in HBM."""
    x = logits_ref[...].astype(jnp.float32)               # (M, V)
    m = jnp.max(x, axis=-1, keepdims=True)
    e = jnp.exp(x - m)
    lse = jnp.log(jnp.sum(e, axis=-1, keepdims=True)) + m
    logp = x - lse                                        # (M, V)
    tgt = trg_ref[...]                                    # (M, 1) int32
    col = jax.lax.broadcasted_iota(jnp.int32, x.shape, 1)
    picked = jnp.sum(jnp.where(col == tgt, logp, 0.0), axis=-1, keepdims=True)  # (M, 1)
    valid = (tgt != pad_index).astype(jnp.float32)
    o_ref[0, 0] = -jnp.sum(picked * valid)


# ----------------------------- pallas_call wrappers ---------------------------
def _rep2(shape):
    """BlockSpec for a small replicated (per-grid-step) 2D parameter block."""
    return pl.BlockSpec(shape, lambda b: (0, 0))


_ENC_PARAM_ORDER = [
    ("ln_g", (1, D)), ("ln_b", (1, D)),
    ("wqkv", (D, 3 * D)), ("bqkv", (1, 3 * D)),
    ("wo", (D, D)), ("bo", (1, D)),
    ("ff_ln_g", (1, D)), ("ff_ln_b", (1, D)),
    ("w1", (D, FF)), ("b1", (1, FF)),
    ("w2", (FF, D)), ("b2", (1, D)),
]

_DEC_PARAM_ORDER = [
    ("ln1_g", (1, D)), ("ln1_b", (1, D)),
    ("s_wqkv", (D, 3 * D)), ("s_bqkv", (1, 3 * D)),
    ("s_wo", (D, D)), ("s_bo", (1, D)),
    ("ln2_g", (1, D)), ("ln2_b", (1, D)),
    ("c_wq", (D, D)), ("c_bq", (1, D)),
    ("c_wkv", (D, 2 * D)), ("c_bkv", (1, 2 * D)),
    ("c_wo", (D, D)), ("c_bo", (1, D)),
    ("ff_ln_g", (1, D)), ("ff_ln_b", (1, D)),
    ("w1", (D, FF)), ("b1", (1, FF)),
    ("w2", (FF, D)), ("b2", (1, D)),
]


def encoder_layer(x, kmask, lp):
    """x: (B, S, D), kmask: (B, 1, S) float32 -> (B, S, D). One fused kernel per layer."""
    B, S, Dm = x.shape
    in_specs = [
        pl.BlockSpec((1, S, Dm), lambda b: (b, 0, 0)),
        pl.BlockSpec((1, 1, S), lambda b: (b, 0, 0)),
    ] + [_rep2(shape) for _, shape in _ENC_PARAM_ORDER]
    args = [x, kmask] + [lp[name] for name, _ in _ENC_PARAM_ORDER]
    return pl.pallas_call(
        _encoder_layer_kernel,
        out_shape=jax.ShapeDtypeStruct((B, S, Dm), x.dtype),
        grid=(B,),
        in_specs=in_specs,
        out_specs=pl.BlockSpec((1, S, Dm), lambda b: (b, 0, 0)),
        compiler_params=pltpu.CompilerParams(
            dimension_semantics=("parallel",),
            vmem_limit_bytes=VMEM_LIMIT),
    )(*args)


def decoder_layer(x, enc_out, tmask, smask, lp):
    """x: (B, T, D), enc_out: (B, S, D), tmask: (B,1,T), smask: (B,1,S) -> (B, T, D)."""
    B, T, Dm = x.shape
    S = enc_out.shape[1]
    in_specs = [
        pl.BlockSpec((1, T, Dm), lambda b: (b, 0, 0)),
        pl.BlockSpec((1, S, Dm), lambda b: (b, 0, 0)),
        pl.BlockSpec((1, 1, T), lambda b: (b, 0, 0)),
        pl.BlockSpec((1, 1, S), lambda b: (b, 0, 0)),
    ] + [_rep2(shape) for _, shape in _DEC_PARAM_ORDER]
    args = [x, enc_out, tmask, smask] + [lp[name] for name, _ in _DEC_PARAM_ORDER]
    return pl.pallas_call(
        _decoder_layer_kernel,
        out_shape=jax.ShapeDtypeStruct((B, T, Dm), x.dtype),
        grid=(B,),
        in_specs=in_specs,
        out_specs=pl.BlockSpec((1, T, Dm), lambda b: (b, 0, 0)),
        compiler_params=pltpu.CompilerParams(
            dimension_semantics=("parallel",),
            vmem_limit_bytes=VMEM_LIMIT),
    )(*args)


def pallas_layernorm(x, g, b):
    """x: (B, S, D), g/b: (1, D)."""
    B, S, Dm = x.shape
    return pl.pallas_call(
        _layernorm_kernel,
        out_shape=jax.ShapeDtypeStruct((B, S, Dm), x.dtype),
        grid=(B,),
        in_specs=[
            pl.BlockSpec((1, S, Dm), lambda i: (i, 0, 0)),
            pl.BlockSpec((1, Dm), lambda i: (0, 0)),
            pl.BlockSpec((1, Dm), lambda i: (0, 0)),
        ],
        out_specs=pl.BlockSpec((1, S, Dm), lambda i: (i, 0, 0)),
        compiler_params=pltpu.CompilerParams(dimension_semantics=("parallel",)),
    )(x, g, b)


def pallas_output_logits(x, ln_g, ln_b, w):
    """Fused final decoder LayerNorm + vocab projection (bias=False). x: (B, T, D) -> (B, T, V)."""
    B, T, Dm = x.shape
    V = w.shape[1]
    return pl.pallas_call(
        _final_logits_kernel,
        out_shape=jax.ShapeDtypeStruct((B, T, V), x.dtype),
        grid=(B,),
        in_specs=[
            pl.BlockSpec((1, T, Dm), lambda b: (b, 0, 0)),
            pl.BlockSpec((1, Dm), lambda b: (0, 0)),
            pl.BlockSpec((1, Dm), lambda b: (0, 0)),
            pl.BlockSpec((Dm, V), lambda b: (0, 0)),
        ],
        out_specs=pl.BlockSpec((1, T, V), lambda b: (b, 0, 0)),
        compiler_params=pltpu.CompilerParams(dimension_semantics=("parallel",)),
    )(x, ln_g, ln_b, w)


def pallas_xent_loss(logits, trg, pad_index):
    """joeynmt XentLoss (NLL, sum reduction, ignore_index=pad), log_softmax fused in."""
    B, T, V = logits.shape
    M = B * T
    loss = pl.pallas_call(
        functools.partial(_xent_loss_kernel, pad_index=pad_index),
        out_shape=jax.ShapeDtypeStruct((1, 1), jnp.float32),
        grid=(1,),
        in_specs=[
            pl.BlockSpec((M, V), lambda i: (0, 0)),
            pl.BlockSpec((M, 1), lambda i: (0, 0)),
        ],
        out_specs=pl.BlockSpec((1, 1), lambda i: (0, 0)),
    )(logits.reshape(M, V), trg.reshape(M, 1).astype(jnp.int32))
    return loss[0, 0]


# ----------------------------- embeddings / PE (plain JAX) --------------------
def sinusoidal_pe(length, d):
    pos = jnp.arange(length, dtype=jnp.float32)[:, None]
    div = jnp.exp(jnp.arange(0, d, 2, dtype=jnp.float32) * (-jnp.log(10000.0) / d))
    pe = jnp.zeros((length, d), dtype=jnp.float32)
    pe = pe.at[:, 0::2].set(jnp.sin(pos * div))
    pe = pe.at[:, 1::2].set(jnp.cos(pos * div))
    return pe


def embed(table, tokens, scale=True):
    # joeynmt Embeddings: lookup, optionally scaled by sqrt(embedding_dim)
    x = jnp.take(table, tokens, axis=0)
    if scale:
        x = x * jnp.sqrt(jnp.float32(table.shape[1]))
    return x


# ----------------------------- the Model -------------------------------------
class PallasModel:
    """Pallas re-implementation of joeynmt Model (Transformer encoder/decoder)."""

    def __init__(self, params):
        self.params = params
        self.bos_index = BOS_IDX
        self.pad_index = PAD_IDX
        self.eos_index = EOS_IDX
        self._loss_function = None

    @property
    def loss_function(self):
        return self._loss_function

    @loss_function.setter
    def loss_function(self, fn):
        self._loss_function = fn

    # ---- forward (interface identical to the PyTorch module) ----
    def __call__(self, return_type=None, **kwargs):
        if return_type is None:
            raise ValueError("Please specify return_type: {`loss`, `encode`, `decode`}.")
        return_tuple = (None, None, None, None)
        if return_type == "loss":
            assert self.loss_function is not None
            out, _, _, _ = self._encode_decode(**kwargs)
            # log_softmax is fused INSIDE the loss kernel (saves an extra
            # (B*T, V) HBM round-trip); numerically identical to
            # F.log_softmax(out) followed by NLL with ignore_index=pad.
            batch_loss = self.loss_function(out, kwargs["trg"])
            return_tuple = (batch_loss, None, None, None)
        elif return_type == "encode":
            encoder_output, encoder_hidden = self._encode(**kwargs)
            return_tuple = (encoder_output, encoder_hidden, None, None)
        elif return_type == "decode":
            outputs, hidden, att_probs, att_vectors = self._decode(**kwargs)
            return_tuple = (outputs, hidden, att_probs, att_vectors)
        return return_tuple

    def _encode_decode(self, src, trg_input, src_mask, src_length, trg_mask=None, **kwargs):
        encoder_output, encoder_hidden = self._encode(
            src=src, src_length=src_length, src_mask=src_mask, **kwargs)
        unroll_steps = trg_input.shape[1]
        return self._decode(encoder_output=encoder_output, encoder_hidden=encoder_hidden,
                            src_mask=src_mask, trg_input=trg_input,
                            unroll_steps=unroll_steps, trg_mask=trg_mask, **kwargs)

    # ---- Transformer encoder: one fused Pallas kernel per layer ----
    def _encode(self, src, src_length, src_mask, **_kwargs):
        p = self.params
        B, S = src.shape
        x = embed(p["src_embed"], src)
        x = x + sinusoidal_pe(S, D)[None]
        kmask = src_mask.astype(jnp.float32)                  # (B, 1, S), 1 = valid
        for layer in p["enc_layers"]:
            x = encoder_layer(x, kmask, layer)
        x = pallas_layernorm(x, p["enc_final_ln_g"], p["enc_final_ln_b"])
        return x, None  # transformer encoder has no final hidden state (joeynmt returns None)

    # ---- Transformer decoder: one fused Pallas kernel per layer ----
    def _decode(self, encoder_output, encoder_hidden, src_mask, trg_input,
                unroll_steps, decoder_hidden=None, att_vector=None, trg_mask=None, **_kwargs):
        p = self.params
        B, T = trg_input.shape
        x = embed(p["trg_embed"], trg_input)
        x = x + sinusoidal_pe(T, D)[None]
        if trg_mask is None:
            trg_mask = jnp.ones((B, 1, T), dtype=jnp.float32)
        tmask = trg_mask.astype(jnp.float32)                  # (B, 1, T); causal built in-kernel
        smask = src_mask.astype(jnp.float32)                  # (B, 1, S)
        for layer in p["dec_layers"]:
            x = decoder_layer(x, encoder_output, tmask, smask, layer)
        logits = pallas_output_logits(x, p["dec_final_ln_g"], p["dec_final_ln_b"], p["out_w"])
        # TODO(synk): cross-attention probabilities are not returned (would need the fused
        # layer kernel to also emit the softmax matrix); joeynmt returns them.
        return logits, None, None, None


# ----------------------------- deterministic params --------------------------
def init_params(key):
    keys = iter(jax.random.split(key, 256))

    def nrm(shape, s=0.02):
        return jax.random.normal(next(keys), shape, dtype=jnp.float32) * s

    def zeros(shape):
        return jnp.zeros(shape, jnp.float32)

    def ones(shape):
        return jnp.ones(shape, jnp.float32)

    def enc_layer():
        return dict(ln_g=ones((1, D)), ln_b=zeros((1, D)),
                    wqkv=nrm((D, 3 * D)), bqkv=zeros((1, 3 * D)),
                    wo=nrm((D, D)), bo=zeros((1, D)),
                    ff_ln_g=ones((1, D)), ff_ln_b=zeros((1, D)),
                    w1=nrm((D, FF)), b1=zeros((1, FF)),
                    w2=nrm((FF, D)), b2=zeros((1, D)))

    def dec_layer():
        return dict(ln1_g=ones((1, D)), ln1_b=zeros((1, D)),
                    s_wqkv=nrm((D, 3 * D)), s_bqkv=zeros((1, 3 * D)),
                    s_wo=nrm((D, D)), s_bo=zeros((1, D)),
                    ln2_g=ones((1, D)), ln2_b=zeros((1, D)),
                    c_wq=nrm((D, D)), c_bq=zeros((1, D)),
                    c_wkv=nrm((D, 2 * D)), c_bkv=zeros((1, 2 * D)),
                    c_wo=nrm((D, D)), c_bo=zeros((1, D)),
                    ff_ln_g=ones((1, D)), ff_ln_b=zeros((1, D)),
                    w1=nrm((D, FF)), b1=zeros((1, FF)),
                    w2=nrm((FF, D)), b2=zeros((1, D)))

    return dict(
        src_embed=nrm((VOCAB, D)),
        trg_embed=nrm((VOCAB, D)),
        enc_layers=[enc_layer() for _ in range(N_LAYERS)],
        dec_layers=[dec_layer() for _ in range(N_LAYERS)],
        enc_final_ln_g=ones((1, D)), enc_final_ln_b=zeros((1, D)),
        dec_final_ln_g=ones((1, D)), dec_final_ln_b=zeros((1, D)),
        out_w=nrm((D, VOCAB)),   # joeynmt output layer: bias=False (no out_b)
    )


# ----------------------------- main -------------------------------------------
if __name__ == "__main__":
    key = jax.random.PRNGKey(0)
    k_par, k_src, k_trg = jax.random.split(key, 3)

    B, S_SRC, S_TRG = 2, 8, 8
    params = init_params(k_par)
    model = PallasModel(params)
    model.loss_function = functools.partial(pallas_xent_loss, pad_index=PAD_IDX)

    # deterministic toy batch
    src = jax.random.randint(k_src, (B, S_SRC), 4, VOCAB).astype(jnp.int32)
    trg = jax.random.randint(k_trg, (B, S_TRG), 4, VOCAB).astype(jnp.int32)
    # pad the tail of the second source sentence to exercise masking
    src = src.at[1, -2:].set(PAD_IDX)
    trg_input = jnp.concatenate(
        [jnp.full((B, 1), BOS_IDX, dtype=jnp.int32), trg[:, :-1]], axis=1)
    src_mask = (src != PAD_IDX)[:, None, :]          # (B, 1, S_src)
    trg_mask = (trg_input != PAD_IDX)[:, None, :]    # (B, 1, S_trg)
    src_length = jnp.sum(src != PAD_IDX, axis=1)

    # encode
    enc_out, enc_hidden, _, _ = model(return_type="encode",
                                      src=src, src_length=src_length, src_mask=src_mask)
    # decode
    dec_out, _, _, _ = model(return_type="decode",
                             encoder_output=enc_out, encoder_hidden=enc_hidden,
                             src_mask=src_mask, trg_input=trg_input,
                             unroll_steps=S_TRG, trg_mask=trg_mask)
    # loss
    loss, _, _, _ = model(return_type="loss",
                          src=src, trg_input=trg_input, src_mask=src_mask,
                          src_length=src_length, trg_mask=trg_mask, trg=trg)

    jax.block_until_ready((enc_out, dec_out, loss))
    assert enc_out.shape == (B, S_SRC, D)
    assert dec_out.shape == (B, S_TRG, VOCAB)
    assert bool(jnp.isfinite(loss))
    print("KERNEL_OK")
</pallas_src>

<mosaic_0001>
module attributes {stable_mosaic.version = 11 : i64} {
  func.func @_encoder_layer_kernel(%arg0: i32, %arg1: memref<1x8x128xf32, #tpu.memory_space<vmem>>, %arg2: memref<1x1x8xf32, #tpu.memory_space<vmem>>, %arg3: memref<1x128xf32, #tpu.memory_space<vmem>>, %arg4: memref<1x128xf32, #tpu.memory_space<vmem>>, %arg5: memref<128x384xf32, #tpu.memory_space<vmem>>, %arg6: memref<1x384xf32, #tpu.memory_space<vmem>>, %arg7: memref<128x128xf32, #tpu.memory_space<vmem>>, %arg8: memref<1x128xf32, #tpu.memory_space<vmem>>, %arg9: memref<1x128xf32, #tpu.memory_space<vmem>>, %arg10: memref<1x128xf32, #tpu.memory_space<vmem>>, %arg11: memref<128x256xf32, #tpu.memory_space<vmem>>, %arg12: memref<1x256xf32, #tpu.memory_space<vmem>>, %arg13: memref<256x128xf32, #tpu.memory_space<vmem>>, %arg14: memref<1x128xf32, #tpu.memory_space<vmem>>, %arg15: memref<1x8x128xf32, #tpu.memory_space<vmem>>) attributes {dimension_semantics = [#tpu.dimension_semantics<parallel>], iteration_bounds = array<i64: 2>, scalar_prefetch = 0 : i64, scratch_operands = 0 : i64, tpu.core_type = #tpu.core_type<tc>, window_params = [{transform_indices = @transform_0, window_bounds = array<i64: 1, 8, 128>}, {transform_indices = @transform_1, window_bounds = array<i64: 1, 1, 8>}, {pipeline_mode = #tpu.pipeline_mode<synchronous>, transform_indices = @transform_2, window_bounds = array<i64: 1, 128>}, {pipeline_mode = #tpu.pipeline_mode<synchronous>, transform_indices = @transform_3, window_bounds = array<i64: 1, 128>}, {pipeline_mode = #tpu.pipeline_mode<synchronous>, transform_indices = @transform_4, window_bounds = array<i64: 128, 384>}, {pipeline_mode = #tpu.pipeline_mode<synchronous>, transform_indices = @transform_5, window_bounds = array<i64: 1, 384>}, {pipeline_mode = #tpu.pipeline_mode<synchronous>, transform_indices = @transform_6, window_bounds = array<i64: 128, 128>}, {pipeline_mode = #tpu.pipeline_mode<synchronous>, transform_indices = @transform_7, window_bounds = array<i64: 1, 128>}, {pipeline_mode = #tpu.pipeline_mode<synchronous>, transform_indices = @transform_8, window_bounds = array<i64: 1, 128>}, {pipeline_mode = #tpu.pipeline_mode<synchronous>, transform_indices = @transform_9, window_bounds = array<i64: 1, 128>}, {pipeline_mode = #tpu.pipeline_mode<synchronous>, transform_indices = @transform_10, window_bounds = array<i64: 128, 256>}, {pipeline_mode = #tpu.pipeline_mode<synchronous>, transform_indices = @transform_11, window_bounds = array<i64: 1, 256>}, {pipeline_mode = #tpu.pipeline_mode<synchronous>, transform_indices = @transform_12, window_bounds = array<i64: 256, 128>}, {pipeline_mode = #tpu.pipeline_mode<synchronous>, transform_indices = @transform_13, window_bounds = array<i64: 1, 128>}, {transform_indices = @transform_14, window_bounds = array<i64: 1, 8, 128>}]} {
    %c0 = arith.constant 0 : index
    %c0_0 = arith.constant 0 : index
    %c0_1 = arith.constant 0 : index
    %0 = vector.load %arg1[%c0, %c0_0, %c0_1] : memref<1x8x128xf32, #tpu.memory_space<vmem>>, vector<1x8x128xf32>
    %1 = vector.shape_cast %0 : vector<1x8x128xf32> to vector<8x128xf32>
    %c0_2 = arith.constant 0 : index
    %c0_3 = arith.constant 0 : index
    %c0_4 = arith.constant 0 : index
    %2 = vector.load %arg2[%c0_2, %c0_3, %c0_4] : memref<1x1x8xf32, #tpu.memory_space<vmem>>, vector<1x1x8xf32>
    %3 = vector.shape_cast %2 : vector<1x1x8xf32> to vector<1x8xf32>
    %c0_5 = arith.constant 0 : index
    %c0_6 = arith.constant 0 : index
    %4 = vector.load %arg3[%c0_5, %c0_6] : memref<1x128xf32, #tpu.memory_space<vmem>>, vector<1x128xf32>
    %c0_7 = arith.constant 0 : index
    %c0_8 = arith.constant 0 : index
    %5 = vector.load %arg4[%c0_7, %c0_8] : memref<1x128xf32, #tpu.memory_space<vmem>>, vector<1x128xf32>
    %cst = arith.constant dense<0.000000e+00> : vector<8xf32>
    %6 = vector.multi_reduction <add>, %1, %cst [1] : vector<8x128xf32> to vector<8xf32>
    %7 = vector.shape_cast %6 : vector<8xf32> to vector<8x1xf32>
    %cst_9 = arith.constant 1.280000e+02 : f32
    %8 = vector.broadcast %cst_9 : f32 to vector<8x1xf32>
    %9 = arith.divf %7, %8 : vector<8x1xf32>
    %10 = vector.broadcast %9 : vector<8x1xf32> to vector<8x128xf32>
    %11 = arith.subf %1, %10 : vector<8x128xf32>
    %12 = arith.mulf %11, %11 : vector<8x128xf32>
    %cst_10 = arith.constant dense<0.000000e+00> : vector<8xf32>
    %13 = vector.multi_reduction <add>, %12, %cst_10 [1] : vector<8x128xf32> to vector<8xf32>
    %14 = vector.shape_cast %13 : vector<8xf32> to vector<8x1xf32>
    %cst_11 = arith.constant 1.280000e+02 : f32
    %15 = vector.broadcast %cst_11 : f32 to vector<8x1xf32>
    %16 = arith.divf %14, %15 : vector<8x1xf32>
    %17 = vector.broadcast %9 : vector<8x1xf32> to vector<8x128xf32>
    %18 = arith.subf %1, %17 : vector<8x128xf32>
    %cst_12 = arith.constant 9.99999997E-7 : f32
    %19 = vector.broadcast %cst_12 : f32 to vector<8x1xf32>
    %20 = arith.addf %16, %19 : vector<8x1xf32>
    %21 = math.rsqrt %20 : vector<8x1xf32>
    %22 = vector.broadcast %21 : vector<8x1xf32> to vector<8x128xf32>
    %23 = arith.mulf %18, %22 : vector<8x128xf32>
    %24 = vector.broadcast %4 : vector<1x128xf32> to vector<8x128xf32>
    %25 = arith.mulf %23, %24 : vector<8x128xf32>
    %26 = vector.broadcast %5 : vector<1x128xf32> to vector<8x128xf32>
    %27 = arith.addf %25, %26 : vector<8x128xf32>
    %c0_13 = arith.constant 0 : index
    %c0_14 = arith.constant 0 : index
    %28 = vector.load %arg5[%c0_13, %c0_14] : memref<128x384xf32, #tpu.memory_space<vmem>>, vector<128x384xf32>
    %cst_15 = arith.constant dense<0.000000e+00> : vector<8x384xf32>
    %29 = tpu.matmul %27, %28, %cst_15 {dimension_numbers = #tpu.dot_dimension_numbers<[1], [0], [0], [1], [0, 0, 1, 1], [], []>} : vector<8x128xf32>, vector<128x384xf32>, vector<8x384xf32> -> vector<8x384xf32>
    %c0_16 = arith.constant 0 : index
    %c0_17 = arith.constant 0 : index
    %30 = vector.load %arg6[%c0_16, %c0_17] : memref<1x384xf32, #tpu.memory_space<vmem>>, vector<1x384xf32>
    %31 = vector.broadcast %30 : vector<1x384xf32> to vector<8x384xf32>
    %32 = arith.addf %29, %31 : vector<8x384xf32>
    %33 = vector.extract_strided_slice %32 {offsets = [0, 0], sizes = [8, 128], strides = [1, 1]} : vector<8x384xf32> to vector<8x128xf32>
    %34 = vector.extract_strided_slice %32 {offsets = [0, 128], sizes = [8, 128], strides = [1, 1]} : vector<8x384xf32> to vector<8x128xf32>
    %35 = vector.extract_strided_slice %32 {offsets = [0, 256], sizes = [8, 128], strides = [1, 1]} : vector<8x384xf32> to vector<8x128xf32>
    %c0_18 = arith.constant 0 : index
    %c0_19 = arith.constant 0 : index
    %36 = vector.load %arg7[%c0_18, %c0_19] : memref<128x128xf32, #tpu.memory_space<vmem>>, vector<128x128xf32>
    %cst_20 = arith.constant 0.000000e+00 : f32
    %37 = vector.broadcast %cst_20 : f32 to vector<1x8xf32>
    %38 = arith.cmpf ogt, %3, %37 : vector<1x8xf32>
    %39 = vector.extract_strided_slice %33 {offsets = [0, 0], sizes = [8, 32], strides = [1, 1]} : vector<8x128xf32> to vector<8x32xf32>
    %40 = vector.extract_strided_slice %34 {offsets = [0, 0], sizes = [8, 32], strides = [1, 1]} : vector<8x128xf32> to vector<8x32xf32>
    %41 = vector.extract_strided_slice %35 {offsets = [0, 0], sizes = [8, 32], strides = [1, 1]} : vector<8x128xf32> to vector<8x32xf32>
    %cst_21 = arith.constant dense<0.000000e+00> : vector<8x8xf32>
    %42 = tpu.matmul %39, %40, %cst_21 {dimension_numbers = #tpu.dot_dimension_numbers<[1], [1], [0], [0], [0, 0, 1, 0], [], []>} : vector<8x32xf32>, vector<8x32xf32>, vector<8x8xf32> -> vector<8x8xf32>
    %cst_22 = arith.constant 0.176776692 : f32
    %43 = vector.broadcast %cst_22 : f32 to vector<8x8xf32>
    %44 = arith.mulf %42, %43 : vector<8x8xf32>
    %cst_23 = arith.constant -1.000000e+09 : f32
    %45 = vector.shape_cast %38 : vector<1x8xi1> to vector<1x8xi1>
    %46 = vector.broadcast %45 : vector<1x8xi1> to vector<8x8xi1>
    %47 = vector.broadcast %cst_23 : f32 to vector<8x8xf32>
    %48 = arith.select %46, %44, %47 : vector<8x8xi1>, vector<8x8xf32>
    %cst_24 = arith.constant dense<0xFF800000> : vector<8xf32>
    %49 = vector.multi_reduction <maximumf>, %48, %cst_24 [1] : vector<8x8xf32> to vector<8xf32>
    %50 = vector.shape_cast %49 : vector<8xf32> to vector<8x1xf32>
    %51 = vector.broadcast %50 : vector<8x1xf32> to vector<8x8xf32>
    %52 = arith.subf %48, %51 : vector<8x8xf32>
    %53 = math.exp %52 : vector<8x8xf32>
    %cst_25 = arith.constant dense<0.000000e+00> : vector<8xf32>
    %54 = vector.multi_reduction <add>, %53, %cst_25 [1] : vector<8x8xf32> to vector<8xf32>
    %55 = vector.shape_cast %54 : vector<8xf32> to vector<8x1xf32>
    %56 = tpu.reciprocal %55 {approx = true} : vector<8x1xf32> -> vector<8x1xf32>
    %57 = vector.broadcast %56 : vector<8x1xf32> to vector<8x8xf32>
    %58 = arith.mulf %53, %57 : vector<8x8xf32>
    %cst_26 = arith.constant dense<0.000000e+00> : vector<8x32xf32>
    %59 = tpu.matmul %58, %41, %cst_26 {dimension_numbers = #tpu.dot_dimension_numbers<[1], [0], [0], [1], [0, 0, 1, 1], [], []>} : vector<8x8xf32>, vector<8x32xf32>, vector<8x32xf32> -> vector<8x32xf32>
    %60 = vector.extract_strided_slice %36 {offsets = [0, 0], sizes = [32, 128], strides = [1, 1]} : vector<128x128xf32> to vector<32x128xf32>
    %cst_27 = arith.constant dense<0.000000e+00> : vector<8x128xf32>
    %61 = tpu.matmul %59, %60, %cst_27 {dimension_numbers = #tpu.dot_dimension_numbers<[1], [0], [0], [1], [0, 0, 1, 1], [], []>} : vector<8x32xf32>, vector<32x128xf32>, vector<8x128xf32> -> vector<8x128xf32>
    %62 = vector.extract_strided_slice %33 {offsets = [0, 32], sizes = [8, 32], strides = [1, 1]} : vector<8x128xf32> to vector<8x32xf32>
    %63 = vector.extract_strided_slice %34 {offsets = [0, 32], sizes = [8, 32], strides = [1, 1]} : vector<8x128xf32> to vector<8x32xf32>
    %64 = vector.extract_strided_slice %35 {offsets = [0, 32], sizes = [8, 32], strides = [1, 1]} : vector<8x128xf32> to vector<8x32xf32>
    %cst_28 = arith.constant dense<0.000000e+00> : vector<8x8xf32>
    %65 = tpu.matmul %62, %63, %cst_28 {dimension_numbers = #tpu.dot_dimension_numbers<[1], [1], [0], [0], [0, 0, 1, 0], [], []>} : vector<8x32xf32>, vector<8x32xf32>, vector<8x8xf32> -> vector<8x8xf32>
    %cst_29 = arith.constant 0.176776692 : f32
    %66 = vector.broadcast %cst_29 : f32 to vector<8x8xf32>
    %67 = arith.mulf %65, %66 : vector<8x8xf32>
    %cst_30 = arith.constant -1.000000e+09 : f32
    %68 = vector.shape_cast %38 : vector<1x8xi1> to vector<1x8xi1>
    %69 = vector.broadcast %68 : vector<1x8xi1> to vector<8x8xi1>
    %70 = vector.broadcast %cst_30 : f32 to vector<8x8xf32>
    %71 = arith.select %69, %67, %70 : vector<8x8xi1>, vector<8x8xf32>
    %cst_31 = arith.constant dense<0xFF800000> : vector<8xf32>
    %72 = vector.multi_reduction <maximumf>, %71, %cst_31 [1] : vector<8x8xf32> to vector<8xf32>
    %73 = vector.shape_cast %72 : vector<8xf32> to vector<8x1xf32>
    %74 = vector.broadcast %73 : vector<8x1xf32> to vector<8x8xf32>
    %75 = arith.subf %71, %74 : vector<8x8xf32>
    %76 = math.exp %75 : vector<8x8xf32>
    %cst_32 = arith.constant dense<0.000000e+00> : vector<8xf32>
    %77 = vector.multi_reduction <add>, %76, %cst_32 [1] : vector<8x8xf32> to vector<8xf32>
    %78 = vector.shape_cast %77 : vector<8xf32> to vector<8x1xf32>
    %79 = tpu.reciprocal %78 {approx = true} : vector<8x1xf32> -> vector<8x1xf32>
    %80 = vector.broadcast %79 : vector<8x1xf32> to vector<8x8xf32>
    %81 = arith.mulf %76, %80 : vector<8x8xf32>
    %cst_33 = arith.constant dense<0.000000e+00> : vector<8x32xf32>
    %82 = tpu.matmul %81, %64, %cst_33 {dimension_numbers = #tpu.dot_dimension_numbers<[1], [0], [0], [1], [0, 0, 1, 1], [], []>} : vector<8x8xf32>, vector<8x32xf32>, vector<8x32xf32> -> vector<8x32xf32>
    %83 = vector.extract_strided_slice %36 {offsets = [32, 0], sizes = [32, 128], strides = [1, 1]} : vector<128x128xf32> to vector<32x128xf32>
    %cst_34 = arith.constant dense<0.000000e+00> : vector<8x128xf32>
    %84 = tpu.matmul %82, %83, %cst_34 {dimension_numbers = #tpu.dot_dimension_numbers<[1], [0], [0], [1], [0, 0, 1, 1], [], []>} : vector<8x32xf32>, vector<32x128xf32>, vector<8x128xf32> -> vector<8x128xf32>
    %85 = arith.addf %61, %84 : vector<8x128xf32>
    %86 = vector.extract_strided_slice %33 {offsets = [0, 64], sizes = [8, 32], strides = [1, 1]} : vector<8x128xf32> to vector<8x32xf32>
    %87 = vector.extract_strided_slice %34 {offsets = [0, 64], sizes = [8, 32], strides = [1, 1]} : vector<8x128xf32> to vector<8x32xf32>
    %88 = vector.extract_strided_slice %35 {offsets = [0, 64], sizes = [8, 32], strides = [1, 1]} : vector<8x128xf32> to vector<8x32xf32>
    %cst_35 = arith.constant dense<0.000000e+00> : vector<8x8xf32>
    %89 = tpu.matmul %86, %87, %cst_35 {dimension_numbers = #tpu.dot_dimension_numbers<[1], [1], [0], [0], [0, 0, 1, 0], [], []>} : vector<8x32xf32>, vector<8x32xf32>, vector<8x8xf32> -> vector<8x8xf32>
    %cst_36 = arith.constant 0.176776692 : f32
    %90 = vector.broadcast %cst_36 : f32 to vector<8x8xf32>
    %91 = arith.mulf %89, %90 : vector<8x8xf32>
    %cst_37 = arith.constant -1.000000e+09 : f32
    %92 = vector.shape_cast %38 : vector<1x8xi1> to vector<1x8xi1>
    %93 = vector.broadcast %92 : vector<1x8xi1> to vector<8x8xi1>
    %94 = vector.broadcast %cst_37 : f32 to vector<8x8xf32>
    %95 = arith.select %93, %91, %94 : vector<8x8xi1>, vector<8x8xf32>
    %cst_38 = arith.constant dense<0xFF800000> : vector<8xf32>
    %96 = vector.multi_reduction <maximumf>, %95, %cst_38 [1] : vector<8x8xf32> to vector<8xf32>
    %97 = vector.shape_cast %96 : vector<8xf32> to vector<8x1xf32>
    %98 = vector.broadcast %97 : vector<8x1xf32> to vector<8x8xf32>
    %99 = arith.subf %95, %98 : vector<8x8xf32>
    %100 = math.exp %99 : vector<8x8xf32>
    %cst_39 = arith.constant dense<0.000000e+00> : vector<8xf32>
    %101 = vector.multi_reduction <add>, %100, %cst_39 [1] : vector<8x8xf32> to vector<8xf32>
    %102 = vector.shape_cast %101 : vector<8xf32> to vector<8x1xf32>
    %103 = tpu.reciprocal %102 {approx = true} : vector<8x1xf32> -> vector<8x1xf32>
    %104 = vector.broadcast %103 : vector<8x1xf32> to vector<8x8xf32>
    %105 = arith.mulf %100, %104 : vector<8x8xf32>
    %cst_40 = arith.constant dense<0.000000e+00> : vector<8x32xf32>
    %106 = tpu.matmul %105, %88, %cst_40 {dimension_numbers = #tpu.dot_dimension_numbers<[1], [0], [0], [1], [0, 0, 1, 1], [], []>} : vector<8x8xf32>, vector<8x32xf32>, vector<8x32xf32> -> vector<8x32xf32>
    %107 = vector.extract_strided_slice %36 {offsets = [64, 0], sizes = [32, 128], strides = [1, 1]} : vector<128x128xf32> to vector<32x128xf32>
    %cst_41 = arith.constant dense<0.000000e+00> : vector<8x128xf32>
    %108 = tpu.matmul %106, %107, %cst_41 {dimension_numbers = #tpu.dot_dimension_numbers<[1], [0], [0], [1], [0, 0, 1, 1], [], []>} : vector<8x32xf32>, vector<32x128xf32>, vector<8x128xf32> -> vector<8x128xf32>
    %109 = arith.addf %85, %108 : vector<8x128xf32>
    %110 = vector.extract_strided_slice %33 {offsets = [0, 96], sizes = [8, 32], strides = [1, 1]} : vector<8x128xf32> to vector<8x32xf32>
    %111 = vector.extract_strided_slice %34 {offsets = [0, 96], sizes = [8, 32], strides = [1, 1]} : vector<8x128xf32> to vector<8x32xf32>
    %112 = vector.extract_strided_slice %35 {offsets = [0, 96], sizes = [8, 32], strides = [1, 1]} : vector<8x128xf32> to vector<8x32xf32>
    %cst_42 = arith.constant dense<0.000000e+00> : vector<8x8xf32>
    %113 = tpu.matmul %110, %111, %cst_42 {dimension_numbers = #tpu.dot_dimension_numbers<[1], [1], [0], [0], [0, 0, 1, 0], [], []>} : vector<8x32xf32>, vector<8x32xf32>, vector<8x8xf32> -> vector<8x8xf32>
    %cst_43 = arith.constant 0.176776692 : f32
    %114 = vector.broadcast %cst_43 : f32 to vector<8x8xf32>
    %115 = arith.mulf %113, %114 : vector<8x8xf32>
    %cst_44 = arith.constant -1.000000e+09 : f32
    %116 = vector.shape_cast %38 : vector<1x8xi1> to vector<1x8xi1>
    %117 = vector.broadcast %116 : vector<1x8xi1> to vector<8x8xi1>
    %118 = vector.broadcast %cst_44 : f32 to vector<8x8xf32>
    %119 = arith.select %117, %115, %118 : vector<8x8xi1>, vector<8x8xf32>
    %cst_45 = arith.constant dense<0xFF800000> : vector<8xf32>
    %120 = vector.multi_reduction <maximumf>, %119, %cst_45 [1] : vector<8x8xf32> to vector<8xf32>
    %121 = vector.shape_cast %120 : vector<8xf32> to vector<8x1xf32>
    %122 = vector.broadcast %121 : vector<8x1xf32> to vector<8x8xf32>
    %123 = arith.subf %119, %122 : vector<8x8xf32>
    %124 = math.exp %123 : vector<8x8xf32>
    %cst_46 = arith.constant dense<0.000000e+00> : vector<8xf32>
    %125 = vector.multi_reduction <add>, %124, %cst_46 [1] : vector<8x8xf32> to vector<8xf32>
    %126 = vector.shape_cast %125 : vector<8xf32> to vector<8x1xf32>
    %127 = tpu.reciprocal %126 {approx = true} : vector<8x1xf32> -> vector<8x1xf32>
    %128 = vector.broadcast %127 : vector<8x1xf32> to vector<8x8xf32>
    %129 = arith.mulf %124, %128 : vector<8x8xf32>
    %cst_47 = arith.constant dense<0.000000e+00> : vector<8x32xf32>
    %130 = tpu.matmul %129, %112, %cst_47 {dimension_numbers = #tpu.dot_dimension_numbers<[1], [0], [0], [1], [0, 0, 1, 1], [], []>} : vector<8x8xf32>, vector<8x32xf32>, vector<8x32xf32> -> vector<8x32xf32>
    %131 = vector.extract_strided_slice %36 {offsets = [96, 0], sizes = [32, 128], strides = [1, 1]} : vector<128x128xf32> to vector<32x128xf32>
    %cst_48 = arith.constant dense<0.000000e+00> : vector<8x128xf32>
    %132 = tpu.matmul %130, %131, %cst_48 {dimension_numbers = #tpu.dot_dimension_numbers<[1], [0], [0], [1], [0, 0, 1, 1], [], []>} : vector<8x32xf32>, vector<32x128xf32>, vector<8x128xf32> -> vector<8x128xf32>
    %133 = arith.addf %109, %132 : vector<8x128xf32>
    %c0_49 = arith.constant 0 : index
    %c0_50 = arith.constant 0 : index
    %134 = vector.load %arg8[%c0_49, %c0_50] : memref<1x128xf32, #tpu.memory_space<vmem>>, vector<1x128xf32>
    %135 = vector.broadcast %134 : vector<1x128xf32> to vector<8x128xf32>
    %136 = arith.addf %133, %135 : vector<8x128xf32>
    %137 = arith.addf %1, %136 : vector<8x128xf32>
    %c0_51 = arith.constant 0 : index
    %c0_52 = arith.constant 0 : index
    %138 = vector.load %arg9[%c0_51, %c0_52] : memref<1x128xf32, #tpu.memory_space<vmem>>, vector<1x128xf32>
    %c0_53 = arith.constant 0 : index
    %c0_54 = arith.constant 0 : index
    %139 = vector.load %arg10[%c0_53, %c0_54] : memref<1x128xf32, #tpu.memory_space<vmem>>, vector<1x128xf32>
    %c0_55 = arith.constant 0 : index
    %c0_56 = arith.constant 0 : index
    %140 = vector.load %arg11[%c0_55, %c0_56] : memref<128x256xf32, #tpu.memory_space<vmem>>, vector<128x256xf32>
    %c0_57 = arith.constant 0 : index
    %c0_58 = arith.constant 0 : index
    %141 = vector.load %arg12[%c0_57, %c0_58] : memref<1x256xf32, #tpu.memory_space<vmem>>, vector<1x256xf32>
    %c0_59 = arith.constant 0 : index
    %c0_60 = arith.constant 0 : index
    %142 = vector.load %arg13[%c0_59, %c0_60] : memref<256x128xf32, #tpu.memory_space<vmem>>, vector<256x128xf32>
    %c0_61 = arith.constant 0 : index
    %c0_62 = arith.constant 0 : index
    %143 = vector.load %arg14[%c0_61, %c0_62] : memref<1x128xf32, #tpu.memory_space<vmem>>, vector<1x128xf32>
    %cst_63 = arith.constant dense<0.000000e+00> : vector<8xf32>
    %144 = vector.multi_reduction <add>, %137, %cst_63 [1] : vector<8x128xf32> to vector<8xf32>
    %145 = vector.shape_cast %144 : vector<8xf32> to vector<8x1xf32>
    %cst_64 = arith.constant 1.280000e+02 : f32
    %146 = vector.broadcast %cst_64 : f32 to vector<8x1xf32>
    %147 = arith.divf %145, %146 : vector<8x1xf32>
    %148 = vector.broadcast %147 : vector<8x1xf32> to vector<8x128xf32>
    %149 = arith.subf %137, %148 : vector<8x128xf32>
    %150 = arith.mulf %149, %149 : vector<8x128xf32>
    %cst_65 = arith.constant dense<0.000000e+00> : vector<8xf32>
    %151 = vector.multi_reduction <add>, %150, %cst_65 [1] : vector<8x128xf32> to vector<8xf32>
    %152 = vector.shape_cast %151 : vector<8xf32> to vector<8x1xf32>
    %cst_66 = arith.constant 1.280000e+02 : f32
    %153 = vector.broadcast %cst_66 : f32 to vector<8x1xf32>
    %154 = arith.divf %152, %153 : vector<8x1xf32>
    %155 = vector.broadcast %147 : vector<8x1xf32> to vector<8x128xf32>
    %156 = arith.subf %137, %155 : vector<8x128xf32>
    %cst_67 = arith.constant 9.99999997E-7 : f32
    %157 = vector.broadcast %cst_67 : f32 to vector<8x1xf32>
    %158 = arith.addf %154, %157 : vector<8x1xf32>
    %159 = math.rsqrt %158 : vector<8x1xf32>
    %160 = vector.broadcast %159 : vector<8x1xf32> to vector<8x128xf32>
    %161 = arith.mulf %156, %160 : vector<8x128xf32>
    %162 = vector.broadcast %138 : vector<1x128xf32> to vector<8x128xf32>
    %163 = arith.mulf %161, %162 : vector<8x128xf32>
    %164 = vector.broadcast %139 : vector<1x128xf32> to vector<8x128xf32>
    %165 = arith.addf %163, %164 : vector<8x128xf32>
    %cst_68 = arith.constant dense<0.000000e+00> : vector<8x256xf32>
    %166 = tpu.matmul %165, %140, %cst_68 {dimension_numbers = #tpu.dot_dimension_numbers<[1], [0], [0], [1], [0, 0, 1, 1], [], []>} : vector<8x128xf32>, vector<128x256xf32>, vector<8x256xf32> -> vector<8x256xf32>
    %167 = vector.broadcast %141 : vector<1x256xf32> to vector<8x256xf32>
    %168 = arith.addf %166, %167 : vector<8x256xf32>
    %cst_69 = arith.constant 0.000000e+00 : f32
    %169 = vector.broadcast %cst_69 : f32 to vector<8x256xf32>
    %170 = arith.maximumf %168, %169 : vector<8x256xf32>
    %cst_70 = arith.constant dense<0.000000e+00> : vector<8x128xf32>
    %171 = tpu.matmul %170, %142, %cst_70 {dimension_numbers = #tpu.dot_dimension_numbers<[1], [0], [0], [1], [0, 0, 1, 1], [], []>} : vector<8x256xf32>, vector<256x128xf32>, vector<8x128xf32> -> vector<8x128xf32>
    %172 = vector.broadcast %143 : vector<1x128xf32> to vector<8x128xf32>
    %173 = arith.addf %171, %172 : vector<8x128xf32>
    %174 = arith.addf %137, %173 : vector<8x128xf32>
    %c0_71 = arith.constant 0 : index
    %c0_72 = arith.constant 0 : index
    %c0_73 = arith.constant 0 : index
    %175 = vector.load %arg15[%c0_71, %c0_72, %c0_73] : memref<1x8x128xf32, #tpu.memory_space<vmem>>, vector<1x8x128xf32>
    %176 = vector.shape_cast %175 : vector<1x8x128xf32> to vector<8x128xf32>
    %177 = vector.shape_cast %174 : vector<8x128xf32> to vector<1x8x128xf32>
    tpu.vector_store %arg15[%c0_71, %c0_72, %c0_73], %177 {strides = array<i32>} : memref<1x8x128xf32, #tpu.memory_space<vmem>>, vector<1x8x128xf32>,
    return
  }
  func.func @transform_0(%arg0: i32) -> (i32, i32, i32) {
    %c0_i32 = arith.constant 0 : i32
    %c0_i32_0 = arith.constant 0 : i32
    %c0_i32_1 = arith.constant 0 : i32
    return %arg0, %c0_i32, %c0_i32_0 : i32, i32, i32
  }
  func.func @transform_1(%arg0: i32) -> (i32, i32, i32) {
    %c0_i32 = arith.constant 0 : i32
    %c0_i32_0 = arith.constant 0 : i32
    %c0_i32_1 = arith.constant 0 : i32
    return %arg0, %c0_i32, %c0_i32_0 : i32, i32, i32
  }
  func.func @transform_2(%arg0: i32) -> (i32, i32) {
    %c0_i32 = arith.constant 0 : i32
    %c0_i32_0 = arith.constant 0 : i32
    %c0_i32_1 = arith.constant 0 : i32
    return %c0_i32, %c0_i32_0 : i32, i32
  }
  func.func @transform_3(%arg0: i32) -> (i32, i32) {
    %c0_i32 = arith.constant 0 : i32
    %c0_i32_0 = arith.constant 0 : i32
    %c0_i32_1 = arith.constant 0 : i32
    return %c0_i32, %c0_i32_0 : i32, i32
  }
  func.func @transform_4(%arg0: i32) -> (i32, i32) {
    %c0_i32 = arith.constant 0 : i32
    %c0_i32_0 = arith.constant 0 : i32
    %c0_i32_1 = arith.constant 0 : i32
    return %c0_i32, %c0_i32_0 : i32, i32
  }
  func.func @transform_5(%arg0: i32) -> (i32, i32) {
    %c0_i32 = arith.constant 0 : i32
    %c0_i32_0 = arith.constant 0 : i32
    %c0_i32_1 = arith.constant 0 : i32
    return %c0_i32, %c0_i32_0 : i32, i32
  }
  func.func @transform_6(%arg0: i32) -> (i32, i32) {
    %c0_i32 = arith.constant 0 : i32
    %c0_i32_0 = arith.constant 0 : i32
    %c0_i32_1 = arith.constant 0 : i32
    return %c0_i32, %c0_i32_0 : i32, i32
  }
  func.func @transform_7(%arg0: i32) -> (i32, i32) {
    %c0_i32 = arith.constant 0 : i32
    %c0_i32_0 = arith.constant 0 : i32
    %c0_i32_1 = arith.constant 0 : i32
    return %c0_i32, %c0_i32_0 : i32, i32
  }
  func.func @transform_8(%arg0: i32) -> (i32, i32) {
    %c0_i32 = arith.constant 0 : i32
    %c0_i32_0 = arith.constant 0 : i32
    %c0_i32_1 = arith.constant 0 : i32
    return %c0_i32, %c0_i32_0 : i32, i32
  }
  func.func @transform_9(%arg0: i32) -> (i32, i32) {
    %c0_i32 = arith.constant 0 : i32
    %c0_i32_0 = arith.constant 0 : i32
    %c0_i32_1 = arith.constant 0 : i32
    return %c0_i32, %c0_i32_0 : i32, i32
  }
  func.func @transform_10(%arg0: i32) -> (i32, i32) {
    %c0_i32 = arith.constant 0 : i32
    %c0_i32_0 = arith.constant 0 : i32
    %c0_i32_1 = arith.constant 0 : i32
    return %c0_i32, %c0_i32_0 : i32, i32
  }
  func.func @transform_11(%arg0: i32) -> (i32, i32) {
    %c0_i32 = arith.constant 0 : i32
    %c0_i32_0 = arith.constant 0 : i32
    %c0_i32_1 = arith.constant 0 : i32
    return %c0_i32, %c0_i32_0 : i32, i32
  }
  func.func @transform_12(%arg0: i32) -> (i32, i32) {
    %c0_i32 = arith.constant 0 : i32
    %c0_i32_0 = arith.constant 0 : i32
    %c0_i32_1 = arith.constant 0 : i32
    return %c0_i32, %c0_i32_0 : i32, i32
  }
  func.func @transform_13(%arg0: i32) -> (i32, i32) {
    %c0_i32 = arith.constant 0 : i32
    %c0_i32_0 = arith.constant 0 : i32
    %c0_i32_1 = arith.constant 0 : i32
    return %c0_i32, %c0_i32_0 : i32, i32
  }
  func.func @transform_14(%arg0: i32) -> (i32, i32, i32) {
    %c0_i32 = arith.constant 0 : i32
    %c0_i32_0 = arith.constant 0 : i32
    %c0_i32_1 = arith.constant 0 : i32
    return %arg0, %c0_i32, %c0_i32_0 : i32, i32, i32
  }
}

</mosaic_0001>

<bundles_post_ra>
// kernel: tpu_custom_call.1
= control target key start
LH: loop header
LB: loop body
LE: loop exit
PB: predicated region body
PF: predicated region fallthrough
CT: control target
= control target key end

     0   :  { %s2436_s0 = inlined_call_operand.hbm [shape: f32[2,8,128], index: 0, kind: input, shape index: {}]   ;;  %s2437_s1 = inlined_call_operand.hbm [shape: f32[2,1,8], index: 1, kind: input, shape index: {}]   ;;  %s2438_s2 = inlined_call_operand.hbm [shape: f32[1,128], index: 2, kind: input, shape index: {}]   ;;  %s2439_s3 = inlined_call_operand.hbm [shape: f32[1,128], index: 3, kind: input, shape index: {}]   ;;  %s2440_s4 = inlined_call_operand.hbm [shape: f32[128,384], index: 4, kind: input, shape index: {}]   ;;  %s2441_s5 = inlined_call_operand.vmem [shape: f32[1,384], index: 5, kind: input, shape index: {}]   ;;  %s2442_s6 = inlined_call_operand.hbm [shape: f32[128,128], index: 6, kind: input, shape index: {}]   ;;  %s2443_s7 = inlined_call_operand.vmem [shape: f32[1,128], index: 7, kind: input, shape index: {}]   ;;  %s2444_s8 = inlined_call_operand.vmem [shape: f32[1,128], index: 8, kind: input, shape index: {}]   ;;  %s2445_s9 = inlined_call_operand.vmem [shape: f32[1,128], index: 9, kind: input, shape index: {}]   ;;  %s2446_s10 = inlined_call_operand.hbm [shape: f32[128,256], index: 10, kind: input, shape index: {}]   ;;  %s2447_s11 = inlined_call_operand.vmem [shape: f32[1,256], index: 11, kind: input, shape index: {}]   ;;  %s2448_s12 = inlined_call_operand.hbm [shape: f32[256,128], index: 12, kind: input, shape index: {}]   ;;  %s2449_s13 = inlined_call_operand.vmem [shape: f32[1,128], index: 13, kind: input, shape index: {}]   ;;  %s2450_s14 = inlined_call_operand.hbm [shape: f32[2,8,128], index: 14, kind: output, shape index: {}]  }
   0x1   :  { %2455 = sst [smem:[#allocation27_spill]] %s2438_s2 }
   0x2   :  { %2456 = sst [smem:[#allocation28_spill]] %s2439_s3 }
   0x3   :  { %2457 = sst [smem:[#allocation29_spill]] %s2440_s4 }
   0x4   :  { %2458 = sst [smem:[#allocation30_spill]] %s2442_s6 }
   0x5   :  { %2459 = sst [smem:[#allocation31_spill]] %s2446_s10 }
   0x6   :  { %2460 = sst [smem:[#allocation32_spill]] %s2447_s11 }
   0x7   :  { %2461 = sst [smem:[#allocation33_spill]] %s2448_s12 }
   0x8   :  { %2462 = sst [smem:[#allocation34_spill]] %s2449_s13 }
   0x9   :  { %2463 = sst [smem:[#allocation35_spill]] %s2450_s14 }
   0xa   :  { %19 = vsyncpa [#allocation3], 0 }
   0xb   :  { %21 = vsyncpa [#allocation3 + $0x1], 0 }
   0xc   :  { %22 = vsyncpa [#allocation6], 0 }
   0xd   :  { %24 = vsyncpa [#allocation6 + $0x1], 0 }
   0xe   :  { %25 = vsyncpa [#allocation9], 0 }
   0xf   :  { %26 = vsyncpa [#allocation12], 0 }
  0x10   :  { %27 = vsyncpa [#allocation15], 0 }
  0x11   :  { %28 = vsyncpa [#allocation4], 0 }
  0x12   :  { %30 = vsyncpa [#allocation4 + $0x1], 0  ;;  %s2117_s29 = smov 0   ;;  %s2119_s30 = smov 0  }
  0x13   :  { %s2121_s15 = smov 0   ;;  %s2123_s16 = smov 0  }
  0x14 LB: > { %2464 = sst [smem:[#allocation24_spill]] %s2019_s15  ;;  %s2141_s20 = sadd.s32 4294967295, %s2023_s16   ;;  %s2023_s16 = sphi %s2123_s16, %s2486_s16   ;;  %s2019_s15 = sphi %s2121_s15, %s2488_s15   ;;  %s2015_s30 = sphi %s2119_s30, %s2490_s30   ;;  %s2011_s29 = sphi %s2117_s29, %s2489_s29  }
  0x15   : > { %s2465_s2 = sld [smem:[#allocation27_spill]]  ;;  %p1507_p0 = scmp.ge.s32.totalorder %s2023_s16, 1 }
  0x16   : > { %p57_p1 = scmp.eq.s32.totalorder %s2141_s20, 0  ;;  %p371_p2 = scmp.lt.s32.totalorder %s2023_s16, 3 }
  0x17   : > { %s2025_s22 = smov [#allocation7]   ;;  %s2467_s3 = sld [smem:[#allocation28_spill]] }
  0x18   : > { %p2146_p3 = pnand %p1507_p0, %p371_p2  ;;  %s385_s23 = sshll.u32 %s2025_s22, 4  ;;  %s386_s23 = int_to_ptr.vmem [resolvable:$true] %s385_s23 }
  0x19   : > { %s2026_s28 = smov [#allocation8]   ;;  %s2469_s6 = sld [smem:[#allocation30_spill]] }
  0x1a   : > { %p1576_p5 = pneg %p2146_p3  ;;  %s397_s17 = sshll.u32 %s2026_s28, 4  ;;  %s398_s17 = int_to_ptr.vmem [resolvable:$true] %s397_s17 }
  0x1b   : > { %s383_s19 = sshll.u32 %s2465_s2, 4  ;;  %s2027_s24 = smov [#allocation11]   ;;  %s384_s19 = int_to_ptr.hbm [resolvable:$true] %s383_s19 }
  0x1c   : > { %p2158_p6 = pnand %p1576_p5, %p57_p1  ;;  %s425_s25 = sshll.u32 %s2027_s24, 4  ;;  %s426_s25 = int_to_ptr.vmem [resolvable:$true] %s425_s25 }
  0x1d   : > { %s395_s26 = sshll.u32 %s2467_s3, 4  ;;  %s2470_s4 = sld [smem:[#allocation29_spill]]  ;;  %s396_s26 = int_to_ptr.hbm [resolvable:$true] %s395_s26 }
  0x1e   : > { %1579 = dma.hbm_to_vmem [thread:$0]  (!%p2158_p6), %s384_s19, 16, %s386_s23, [#allocation6]  }
  0x1f   : > { %s423_s2 = sshll.u32 %s2469_s6, 4  ;;  %s2028_s11 = smov 128   ;;  %s424_s2 = int_to_ptr.hbm [resolvable:$true] %s423_s2 }
  0x20   : > { %1582 = dma.hbm_to_vmem [thread:$0]  (!%p2158_p6), %s396_s26, 16, %s398_s17, [#allocation9]  }
  0x21   : > { %s2029_s28 = smov 8   ;;  %s2030_s18 = smov [#allocation10]  }
  0x22   : > { %1588 = dma.hbm_to_vmem [thread:$0]  (!%p2158_p6), %s424_s2, 2048, %s426_s25, [#allocation12], %s2028_s11, %s2028_s11, %s2029_s28  }
  0x23   : > { %s406_s13 = sshll.u32 %s2470_s4, 4  ;;  %s408_s22 = sshll.u32 %s2030_s18, 4  ;;  %s407_s13 = int_to_ptr.hbm [resolvable:$true] %s406_s13  ;;  %s409_s22 = int_to_ptr.vmem [resolvable:$true] %s408_s22 }
  0x24   : > { %s2031_s6 = smov 384   ;;  %s2032_s19 = smov 24  }
  0x25   : > { %1585 = dma.hbm_to_vmem [thread:$0]  (!%p2158_p6), %s407_s13, 6144, %s409_s22, [#allocation9], %s2031_s6, %s2031_s6, %s2032_s19  }
  0x26   : > { %s2471_s10 = sld [smem:[#allocation31_spill]]  ;;  %s2033_s2 = smov [#allocation13]  }
  0x27   : > { %s448_s14 = sshll.u32 %s2033_s2, 4  ;;  %s2472_s12 = sld [smem:[#allocation33_spill]]  ;;  %s449_s14 = int_to_ptr.vmem [resolvable:$true] %s448_s14 }
  0x28   : > { %s2034_s6 = smov 256   ;;  %s2035_s13 = smov 16  }
  0x29   : > { %s2036_s18 = smov [#allocation14]   ;;  %s1506_s19 = sadd.s32 4294967294, %s2023_s16  }
  0x2a   : > { %s465_s22 = sshll.u32 %s2036_s18, 4  ;;  %s2188_s23 = sadd.s32 1, %s2023_s16   ;;  %s466_s22 = int_to_ptr.vmem [resolvable:$true] %s465_s22 }
  0x2b   : > { %2473 = sst [smem:[#allocation25_spill]] %s2188_s23  ;;  %s40_s26 = ssub.s32 %s2023_s16, %s2188_s23 }
  0x2c   : > { %s446_s3 = sshll.u32 %s2471_s10, 4  ;;  %s43_s2 = sadd.s32 1, %s2019_s15  ;;  %s447_s3 = int_to_ptr.hbm [resolvable:$true] %s446_s3 }
  0x2d   : > { %s463_s25 = sshll.u32 %s2472_s12, 4  ;;  %p41_p7 = scmp.eq.s32.totalorder %s40_s26, 0  ;;  %s464_s25 = int_to_ptr.hbm [resolvable:$true] %s463_s25 }
  0x2e   : > { %1591 = dma.hbm_to_vmem [thread:$0]  (!%p2158_p6), %s447_s3, 4096, %s449_s14, [#allocation12], %s2034_s6, %s2034_s6, %s2035_s13  }
  0x2f   : > { %1594 = dma.hbm_to_vmem [thread:$0]  (!%p2158_p6), %s464_s25, 4096, %s466_s22, [#allocation15], %s2028_s11, %s2028_s11, %s2029_s28  }
  0x30   : > { %p50_p8 = scmp.ne.s32.totalorder %s2019_s15, %s2015_s30  ;;  %p51_p9 = scmp.eq.s32.totalorder %s2023_s16, 0 }
  0x31   : > { %p56_p10 = scmp.ne.s32.totalorder %s2015_s30, %s2011_s29  ;;  %p358_p13 = scmp.eq.s32.totalorder %s2141_s20, 1 }
  0x32   : > { %s2199_s3 = scalar_select %p41_p7, %s2019_s15, %s43_s2  }
  0x33   : > { %p2201_p11 = por %p51_p9, %p50_p8  ;;  %p2207_p12 = por %p57_p1, %p56_p10 }
  0x34   : > { %2474 = sst [smem:[#allocation26_spill]] %s2199_s3  ;;  %p364_p0 = scmp.eq.s32.totalorder %s1506_s19, 1 }
  0x35   : > { %p1612_p2 = scmp.lt.s32.totalorder %s2023_s16, 2  ;;  %s2214_s27 = sand.u32 1, %s2019_s15  }
  0x36   : > { %p2216_p5 = por %p358_p13, %p50_p8  ;;  %p2220_p6 = por %p364_p0, %p56_p10 }
  0x37   : > { %s1515_s24 = sshll.u32 %s2214_s27, 3  ;;  %s1516_s25 = sshll.u32 %s2023_s16, 3 }
  0x38   : > { %s490_s18 = scalar_lea.hbm %s2436_s0, %s1516_s25  ;;  %s486_s22 = scalar_lea.vmem [#allocation2], %s1515_s24 }
  0x39   : > { %s494_s19 = sshll.u32 %s486_s22, 4  ;;  %s492_s26 = sshll.u32 %s490_s18, 4  ;;  %s495_s19 = int_to_ptr.vmem [resolvable:$true] %s494_s19  ;;  %s493_s26 = int_to_ptr.hbm [resolvable:$true] %s492_s26 }
  0x3a   : > { %p2231_p7 = pnand %p1612_p2, %p2201_p11  ;;  %s501_s4 = sand.u32 1, %s2023_s16  }
  0x3b   : > { %s483_s10 = scalar_lea.sflag [#allocation3], %s2214_s27  ;;  %s1877_s12 = sshra.s32 %s493_s26, 4  ;;  %s1878_s12 = int_to_ptr.hbm [resolvable:$true] %s1877_s12 }
  0x3c   : > { %s1879_s3 = scalar_lea.hbm %s1878_s12, 8  ;;  %p1881_p9 = pneg %p2231_p7 }
  0x3d   : > { %p1880_p8 = scmp.ne.s32.totalorder %s1878_s12, %s1879_s3  ;;  %s1884_s25 = scalar_lea.hbm %s2436_s0, 16 }
  0x3e   : > { %p1885_p11 = scmp.lt.s32.totalorder %s1878_s12, %s2436_s0  ;;  %p1886_p0 = scmp.lt.s32.totalorder %s1884_s25, %s1879_s3 }
  0x3f   : > { %p1882_p10 = pnand %p1881_p9, %p1880_p8 }
  0x40   : > { %p1887_p2 = por %p1886_p0, %p1885_p11 }
  0x41   : > { %p1883_p13 = pneg %p1882_p10 }
  0x43   : > { %p1888_p4 = pnand %p1887_p2, %p1883_p13 }
  0x45   : > { %1891 = shalt.err (!%p1888_p4)
}
  0x46   : > { %1598 = dma.hbm_to_vmem [thread:$0]  (!%p2231_p7), %s493_s26, 128, %s495_s19, %s483_s10  }
  0x47   : > { %s507_s15 = scalar_lea.hbm %s2437_s1, %s2023_s16  ;;  %s504_s24 = scalar_lea.vmem [#allocation5], %s2214_s27 }
  0x48   : > { %s511_s14 = sshll.u32 %s504_s24, 4  ;;  %s509_s23 = sshll.u32 %s507_s15, 4  ;;  %s512_s14 = int_to_ptr.vmem [resolvable:$true] %s511_s14  ;;  %s510_s23 = int_to_ptr.hbm [resolvable:$true] %s509_s23 }
  0x49   : > { %s502_s12 = scalar_lea.sflag [#allocation6], %s501_s4  ;;  %s1907_s3 = sshra.s32 %s510_s23, 4  ;;  %s1908_s3 = int_to_ptr.hbm [resolvable:$true] %s1907_s3 }
  0x4a   : > { %s1909_s25 = scalar_lea.hbm %s1908_s3, 1  ;;  %s1914_s19 = scalar_lea.hbm %s2437_s1, 2 }
  0x4b   : > { %p1910_p4 = scmp.ne.s32.totalorder %s1908_s3, %s1909_s25  ;;  %p1915_p13 = scmp.lt.s32.totalorder %s1908_s3, %s2437_s1 }
  0x4c   : > { %p1916_p11 = scmp.lt.s32.totalorder %s1914_s19, %s1909_s25 }
  0x4d   : > { %p1912_p8 = pnand %p1910_p4, %p1881_p9 }
  0x4e   : > { %p1917_p0 = por %p1916_p11, %p1915_p13 }
  0x4f   : > { %p1913_p10 = pneg %p1912_p8 }
  0x51   : > { %p1918_p2 = pnand %p1917_p0, %p1913_p10 }
  0x53   : > { %1921 = shalt.err (!%p1918_p2)
}
  0x54   : > { %1601 = dma.hbm_to_vmem [thread:$0]  (!%p2231_p7), %s510_s23, 16, %s512_s14, %s502_s12  }
  0x55   : > { %520 = sbr.rel (%p2146_p3) target bundleno = 2230 (0x8b6), region = 76  ;;  %s2269_s4 = sand.u32 (!%p2146_p3), 1, %s2015_s30  }
  0x56   : > { %s1518_s15 = sshll.u32 (!%p2146_p3), %s2269_s4, 3  ;;  %s523_s27 = scalar_lea.sflag (!%p2146_p3), [#allocation3], %s2269_s4 }
  0x57   : > { %s526_s18 = scalar_lea.vmem (!%p2146_p3), [#allocation2], %s1518_s15 }
  0x5a   : > { %1982 = dma.done.wait (%p2207_p12), %s523_s27, 128  }
  0x5b   : > { %1984 = vsyncadd (%p2207_p12), %s523_s27, 4294967168  ;;  %s532_s21 = sand.u32 1, %s2141_s20   ;;  %s535_s2 = scalar_lea.vmem [#allocation5], %s2269_s4 }
  0x5c   : > { %s533_s23 = scalar_lea.sflag [#allocation6], %s532_s21 }
  0x5d   : > { %1986 = dma.done.wait (%p2207_p12), %s533_s23, 16  }
  0x5e   : > { %1988 = vsyncadd (%p2207_p12), %s533_s23, 4294967280 }
  0x5f   : > { %1990 = dma.done.wait (%p57_p1), [#allocation6], 16  }
  0x60   : > { %1992 = vsyncadd (%p57_p1), [#allocation6], 4294967280 }
  0x61   : > { %1994 = dma.done.wait (%p57_p1), [#allocation9], 6160  }
  0x62   : > { %1996 = vsyncadd (%p57_p1), [#allocation9], 4294961136 }
  0x63   : > { %1998 = dma.done.wait (%p57_p1), [#allocation12], 6144  }
  0x64   : > { %2000 = vsyncadd (%p57_p1), [#allocation12], 4294961152 }
  0x65   : > { %2002 = dma.done.wait (%p57_p1), [#allocation15], 4096  }
  0x66   : > { %2004 = vsyncadd (%p57_p1), [#allocation15], 4294963200  ;;  %v2301_v0 = vld [vmem:[%s526_s18] sm:$0xff]  ;;  %v2037_v1 = vmov 128.0   ;;  %v698_v7 = vld [vmem:[#allocation10 + $0x160] sm:$0xff]  ;;  %vm787_vm4 = vcmask 261120  }
  0x67   : > { %619 = vadd.xlane.f32.xlu0 %v2301_v0  ;;  %1675 = vrcp.f32 %v2037_v1  ;;  %v699_v2 = vld [vmem:[#allocation10 + $0x168] sm:$0xff]  ;;  %v700_v3 = vld [vmem:[#allocation10 + $0x170] sm:$0xff]  ;;  %v701_v4 = vld [vmem:[#allocation10 + $0x178] sm:$0xff]  ;;  %s2038_s24 = smov 64   ;;  %s2039_s14 = smov 96   ;;  %vm819_vm7 = vcmask 64512  }
  0x68   : > { %710 = vmatpush.msra.mxu0 %v699_v2  ;;  %730 = vmatpush.msra.mxu1 %v700_v3  ;;  %v696_v5 = vld [vmem:[#allocation10 + $0x150] sm:$0xff]  ;;  %v697_v6 = vld [vmem:[#allocation10 + $0x158] sm:$0xff]  ;;  %v694_v19 = vld [vmem:[#allocation10 + $0x140] sm:$0xff]  ;;  %s2040_s12 = smov 32   ;;  %s2482_s18 = sld [smem:[#allocation32_spill]] }
  0x69   : > { %750 = vmatpush.msra.mxu2 %v701_v4  ;;  %v693_v18 = vld [vmem:[#allocation10 + $0x138] sm:$0xff]  ;;  %v695_v20 = vld [vmem:[#allocation10 + $0x148] sm:$0xff]  ;;  %v690_v21 = vld [vmem:[#allocation10 + $0x120] sm:$0xff]  ;;  %s1543_s21 = sshll.u32 %s2141_s20, 3  ;;  %s2483_s11 = sld [smem:[#allocation34_spill]] }
  0x6a   : > { %711 = vmatpush.msra.mxu0 %v696_v5  ;;  %731 = vmatpush.msra.mxu1 %v697_v6  ;;  %v691_v22 = vld [vmem:[#allocation10 + $0x128] sm:$0xff]  ;;  %v692_v23 = vld [vmem:[#allocation10 + $0x130] sm:$0xff]  ;;  %v689_v26 = vld [vmem:[#allocation10 + $0x118] sm:$0xff]  ;;  %s614_s3 = scalar_lea.vmem [#allocation16], %s1518_s15  ;;  %s1345_s20 = scalar_lea.sflag [#allocation4], %s2269_s4 }
  0x6b   : > { %751 = vmatpush.msra.mxu2 %v698_v7  ;;  %v687_v24 = vld [vmem:[#allocation10 + $0x108] sm:$0xff]  ;;  %v688_v25 = vld [vmem:[#allocation10 + $0x110] sm:$0xff]  ;;  %v685_v28 = vld [vmem:[#allocation10 + $0xf8] sm:$0xff]  ;;  %s1357_s25 = sshll.u32 %s614_s3, 4  ;;  %s1358_s25 = int_to_ptr.vmem [resolvable:$true] %s1357_s25 }
  0x6c   : > { %712 = vmatpush.msra.mxu0 %v693_v18  ;;  %732 = vmatpush.msra.mxu1 %v694_v19  ;;  %v684_v27 = vld [vmem:[#allocation10 + $0xf0] sm:$0xff]  ;;  %v686_v29 = vld [vmem:[#allocation10 + $0x100] sm:$0xff]  ;;  %v681_v30 = vld [vmem:[#allocation10 + $0xd8] sm:$0xff] }
  0x6d   : > { %v1676_v8 = vpop.eup %1675  ;;  %752 = vmatpush.msra.mxu2 %v695_v20  ;;  %v682_v31 = vld [vmem:[#allocation10 + $0xe0] sm:$0xff]  ;;  %v683_v32 = vld [vmem:[#allocation10 + $0xe8] sm:$0xff]  ;;  %v680_v35 = vld [vmem:[#allocation10 + $0xd0] sm:$0xff] }
  0x6e   : > { %v622_v9 = vmul.f32 128.0, %v1676_v8  ;;  %vm626_vm0 = vweird.f32 %v1676_v8  ;;  %713 = vmatpush.msra.mxu0 %v690_v21  ;;  %733 = vmatpush.msra.mxu1 %v691_v22  ;;  %v678_v33 = vld [vmem:[#allocation10 + $0xc0] sm:$0xff]  ;;  %v679_v34 = vld [vmem:[#allocation10 + $0xc8] sm:$0xff]  ;;  %v676_v37 = vld [vmem:[#allocation10 + $0xb0] sm:$0xff] }
  0x6f   : > { %753 = vmatpush.msra.mxu2 %v692_v23  ;;  %v675_v36 = vld [vmem:[#allocation10 + $0xa8] sm:$0xff]  ;;  %v677_v38 = vld [vmem:[#allocation10 + $0xb8] sm:$0xff]  ;;  %v672_v39 = vld [vmem:[#allocation10 + $0x90] sm:$0xff] }
  0x70   : > { %v623_v10 = vsub.f32 1.0, %v622_v9  ;;  %714 = vmatpush.msra.mxu0 %v687_v24  ;;  %734 = vmatpush.msra.mxu1 %v688_v25  ;;  %v673_v40 = vld [vmem:[#allocation10 + $0x98] sm:$0xff]  ;;  %v674_v41 = vld [vmem:[#allocation10 + $0xa0] sm:$0xff]  ;;  %v671_v44 = vld [vmem:[#allocation10 + $0x88] sm:$0xff] }
  0x71   : > { %754 = vmatpush.msra.mxu2 %v689_v26  ;;  %v669_v42 = vld [vmem:[#allocation10 + $0x78] sm:$0xff]  ;;  %v670_v43 = vld [vmem:[#allocation10 + $0x80] sm:$0xff]  ;;  %v667_v46 = vld [vmem:[#allocation10 + $0x68] sm:$0xff] }
  0x72   : > { %v624_v11 = vmul.f32 %v1676_v8, %v623_v10  ;;  %715 = vmatpush.msra.mxu0 %v684_v27  ;;  %735 = vmatpush.msra.mxu1 %v685_v28  ;;  %v666_v45 = vld [vmem:[#allocation10 + $0x60] sm:$0xff]  ;;  %v668_v47 = vld [vmem:[#allocation10 + $0x70] sm:$0xff]  ;;  %v663_v48 = vld [vmem:[#allocation10 + $0x48] sm:$0xff] }
  0x73   : > { %755 = vmatpush.msra.mxu2 %v686_v29  ;;  %v664_v49 = vld [vmem:[#allocation10 + $0x50] sm:$0xff]  ;;  %v665_v50 = vld [vmem:[#allocation10 + $0x58] sm:$0xff]  ;;  %v662_v53 = vld [vmem:[#allocation10 + $0x40] sm:$0xff] }
  0x74   : > { %v625_v12 = vadd.f32 %v1676_v8, %v624_v11  ;;  %716 = vmatpush.msra.mxu0 %v681_v30  ;;  %736 = vmatpush.msra.mxu1 %v682_v31  ;;  %v660_v51 = vld [vmem:[#allocation10 + $0x30] sm:$0xff]  ;;  %v661_v52 = vld [vmem:[#allocation10 + $0x38] sm:$0xff]  ;;  %v658_v55 = vld [vmem:[#allocation10 + $0x20] sm:$0xff] }
  0x75   : > { %756 = vmatpush.msra.mxu2 %v683_v32  ;;  %v657_v54 = vld [vmem:[#allocation10 + $0x18] sm:$0xff]  ;;  %v659_v56 = vld [vmem:[#allocation10 + $0x28] sm:$0xff]  ;;  %v654_v57 = vld [vmem:[#allocation10] sm:$0xff]  ;;  %v2041_v32 = vmov 0  }
  0x76   : > { %v2304_v13 = vsel %vm626_vm0, %v1676_v8, %v625_v12  ;;  %717 = vmatpush.msra.mxu0 %v678_v33  ;;  %737 = vmatpush.msra.mxu1 %v679_v34  ;;  %v655_v58 = vld [vmem:[#allocation10 + $0x8] sm:$0xff]  ;;  %v656_v59 = vld [vmem:[#allocation10 + $0x10] sm:$0xff]  ;;  %v1669_v6 = vld [vmem:[#allocation7] ss:$0 sm:$0xff] }
  0x77   : > { %757 = vmatpush.msra.mxu2 %v680_v35  ;;  %v1670_v9 = vld [vmem:[#allocation8] ss:$0 sm:$0xff]  ;;  %v702_v12 = vld [vmem:[%s2441_s5] sm:$0x7]  ;;  %v772_v24 = vld [vmem:[#allocation11 + $0x10] sm:$0xff] }
  0x78   : > { %718 = vmatpush.msra.mxu0 %v675_v36  ;;  %738 = vmatpush.msra.mxu1 %v676_v37  ;;  %v773_v23 = vld [vmem:[#allocation11 + $0x18] sm:$0xff]  ;;  %v771_v25 = vld [vmem:[#allocation11 + $0x8] sm:$0xff]  ;;  %v770_v26 = vld [vmem:[#allocation11] sm:$0xff] }
  0x79   : > { %758 = vmatpush.msra.mxu2 %v677_v38  ;;  %v616_v31 = vld [vmem:[%s535_s2] sm:$0x1] }
  0x7a   : > { %719 = vmatpush.msra.mxu0 %v672_v39  ;;  %739 = vmatpush.msra.mxu1 %v673_v40  ;;  %vm786_vm5 = vcmp.gt.f32.partialorder %v616_v31, 0.0  ;;  %v780_v31 = vld [vmem:[#allocation11 + $0x50] sm:$0xff] }
  0x7b   : > { %759 = vmatpush.msra.mxu2 %v674_v41  ;;  %v815_v33 = vsel %vm786_vm5, 1, %v2041_v32  ;;  %v779_v32 = vld [vmem:[#allocation11 + $0x48] sm:$0xff] }
  0x7c   : > { %720 = vmatpush.msra.mxu0 %v669_v42  ;;  %740 = vmatpush.msra.mxu1 %v670_v43  ;;  %v816_v34 = vperm.slane %v815_v33, 0  ;;  %v778_v33 = vld [vmem:[#allocation11 + $0x40] sm:$0xff] }
  0x7d   : > { %760 = vmatpush.msra.mxu2 %v671_v44 }
  0x7e   : > { %721 = vmatpush.msra.mxu0 %v666_v45  ;;  %741 = vmatpush.msra.mxu1 %v667_v46  ;;  %vm2332_vm6 = vcmp.eq.s32.totalorder %v816_v34, 1  ;;  %v785_v34 = vld [vmem:[#allocation11 + $0x78] sm:$0xff] }
  0x7f   : > { %761 = vmatpush.msra.mxu2 %v668_v47 }
  0x80   : > { %722 = vmatpush.msra.mxu0 %v663_v48  ;;  %742 = vmatpush.msra.mxu1 %v664_v49 }
  0x81   : > { %762 = vmatpush.msra.mxu2 %v665_v50 }
  0x82   : > { %723 = vmatpush.msra.mxu0 %v660_v51  ;;  %743 = vmatpush.msra.mxu1 %v661_v52 }
  0x83   : > { %763 = vmatpush.msra.mxu2 %v662_v53 }
  0x84   : > { %724 = vmatpush.msra.mxu0 %v657_v54  ;;  %744 = vmatpush.msra.mxu1 %v658_v55 }
  0x85   : > { %764 = vmatpush.msra.mxu2 %v659_v56 }
  0x86   : > { %725 = vmatpush.msra.mxu0 %v654_v57  ;;  %745 = vmatpush.msra.mxu1 %v655_v58 }
  0x87   : > { %765 = vmatpush.msra.mxu2 %v656_v59 }
  0x88   : > { %960 = vmatpush.msrb.mxu0 %v773_v23 }
  0x8a   : > { %961 = vmatpush.msrb.mxu0 %v772_v24 }
  0x8c   : > { %962 = vmatpush.msrb.mxu0 %v771_v25 }
  0x8e   : > { %963 = vmatpush.msrb.mxu0 %v770_v26  ;;  %v777_v26 = vld [vmem:[#allocation11 + $0x38] sm:$0xff] }
  0xda   : > { %v620_v14 = vpop.xlane.xlu0 %619 }
  0xdb   : > { %v628_v15 = vmul.f32 %v2304_v13, %v620_v14  ;;  %v705_v14 = vperm.slane %v702_v12, 1 }
  0xdd   : > { %v2308_v16 = vsub.f32 %v2301_v0, %v628_v15 }
  0xdf   : > { %v630_v17 = vmul.f32 %v2308_v16, %v2308_v16 }
  0xe1   : > { %631 = vadd.xlane.f32.xlu0 %v630_v17  ;;  %v704_v17 = vperm.slane %v702_v12, 0 }
 0x154   : > { %v632_v60 = vpop.xlane.xlu0 %631 }
 0x155   : > { %v633_v61 = vmul.f32 %v632_v60, %v2304_v13 }
 0x157   : > { %v634_v62 = vadd.f32 1e-06, %v633_v61 }
 0x159   : > { %1677 = vrsqrt.f32 %v634_v62  ;;  %vm641_vm2 = vweird.f32 %v634_v62 }
 0x15f   : > { %v1678_v63 = vpop.eup %1677 }
 0x160   : > { %v636_v1 = vmul.f32 %v1678_v63, %v634_v62  ;;  %vm642_vm1 = vweird.f32 %v1678_v63 }
 0x161   : > { %vm643_vm3 = vmor %vm641_vm2, %vm642_vm1 }
 0x162   : > { %v637_v2 = vmul.f32 %v1678_v63, %v636_v1 }
 0x164   : > { %v638_v3 = vmul.f32 0.5, %v637_v2 }
 0x166   : > { %v639_v4 = vsub.f32 1.5, %v638_v3 }
 0x168   : > { %v640_v5 = vmul.f32 %v1678_v63, %v639_v4 }
 0x16a   : > { %v644_v7 = vsel %vm643_vm3, %v1678_v63, %v640_v5 }
 0x16b   : > { %v645_v8 = vmul.f32 %v644_v7, %v2308_v16  ;;  %v706_v16 = vperm.slane %v702_v12, 2 }
 0x16d   : > { %v649_v10 = vmul.f32 %v1669_v6, %v645_v8 }
 0x16f   : > { %v653_v11 = vadd.f32 %v1670_v9, %v649_v10 }
 0x171   : > { %726 = vmatmul.f32.vlgmr.msra.gmra.mxu0 %v653_v11  ;;  %746 = vmatmul.f32.vlgmr.msra.gmra.mxu1 %v653_v11 }
 0x172   : > { %766 = vmatmul.f32.vlgmr.msra.gmra.mxu2 %v653_v11 }
 0x1ee   : > { %v747_v15 = vpop.f32.mrf.mxu1  ;;  %v727_v19 = vpop.f32.mrf.mxu0 }
 0x1ef   : > { %v748_v18 = vadd.f32 %v747_v15, %v705_v14  ;;  %v728_v20 = vadd.f32 %v727_v19, %v704_v17 }
 0x1f1   : > { %970 = vrot.lane.b32.xlu0 %v748_v18, %s2038_s24  ;;  %856 = vrot.lane.b32.xlu2 %v748_v18, %s2039_s14 }
 0x1f2   : > { %1526 = vmatpush.xpose.msk.msra.mxu3 %vm787_vm4, %v748_v18 }
 0x1f5   : > { %v767_v21 = vpop.f32.mrf.mxu2  ;;  %1527 = vmatmul.msk.f32.vlgmr.msra.gmra.mxu3 %vm787_vm4, %v728_v20 }
 0x1f6   : > { %v2321_v22 = vadd.f32 %v767_v21, %v706_v16 }
 0x1f8   : > { %849 = vmatpush.msrb.mxu3 %v2321_v22 }
 0x1f9   : > { %854 = vrot.lane.b32.xlu2 %v728_v20, %s2039_s14 }
 0x201   : > { %1061 = vrot.lane.b32.xlu2 %v748_v18, %s2040_s12 }
 0x209   : > { %1059 = vrot.lane.b32.xlu2 %v728_v20, %s2040_s12 }
 0x24b   : > { %v857_v27 = vpop.permute.xlu2 %856 }
 0x24c   : > { %1529 = vmatpush.xpose.msk.msra.mxu3 %vm787_vm4, %v857_v27  ;;  %v776_v27 = vld [vmem:[#allocation11 + $0x30] sm:$0xff] }
 0x253   : > { %v855_v28 = vpop.permute.xlu2 %854 }
 0x25b   : > { %v1062_v29 = vpop.permute.xlu2 %1061 }
 0x25c   : > { %1538 = vmatpush.xpose.msk.msra.mxu0 %vm787_vm4, %v1062_v29  ;;  %v774_v29 = vld [vmem:[#allocation11 + $0x20] sm:$0xff] }
 0x263   : > { %v971_v30 = vpop.permute.xlu0 %970  ;;  %v1060_v50 = vpop.permute.xlu2 %1059 }
 0x264   : > { %1534 = vmatpush.xpose.msk.msrb.mxu1 %vm787_vm4, %v971_v30  ;;  %v781_v30 = vld [vmem:[#allocation11 + $0x58] sm:$0xff] }
 0x278   : > { %v811_v35 = vpop.f32.mrf.mxu3 }
 0x279   : > { %v814_v37 = vmul.f32 0.17677669, %v811_v35 }
 0x27b   : > { %v818_v38 = vsel %vm2332_vm6, %v814_v37, -1e+09 }
 0x27c   : > { %v820_v39 = vsel %vm819_vm7, %v818_v38, -inf }
 0x27d   : > { %821 = vmax.xlane.f32.xlu1 %v820_v39 }
 0x2f0   : > { %v822_v40 = vpop.xlane.xlu1 %821 }
 0x2f1   : > { %v823_v41 = vsub.f32 %v818_v38, %v822_v40  ;;  %v784_v40 = vld [vmem:[#allocation11 + $0x70] sm:$0xff] }
 0x2f3   : > { %v824_v42 = vmul.f32 1.442695, %v823_v41  ;;  %v783_v41 = vld [vmem:[#allocation11 + $0x68] sm:$0xff] }
 0x2f5   : > { %1679 = vpow2.f32 %v824_v42  ;;  %v782_v42 = vld [vmem:[#allocation11 + $0x60] sm:$0xff] }
 0x2fb   : > { %v1680_v43 = vpop.eup %1679 }
 0x2fc   : > { %v826_v44 = vsel %vm819_vm7, %v1680_v43, 0.0 }
 0x2fd   : > { %827 = vadd.xlane.f32.xlu1 %v826_v44 }
 0x316   : > { %968 = vrot.lane.b32.xlu1 %v728_v20, %s2038_s24 }
 0x370   : > { %v828_v45 = vpop.xlane.xlu1 %827 }
 0x371   : > { %1681 = vrcp.f32 %v828_v45 }
 0x377   : > { %v1682_v46 = vpop.eup %1681 }
 0x378   : > { %v830_v47 = vmul.f32 %v1682_v46, %v1680_v43 }
 0x37a   : > { %1528 = vmatmul.msk.f32.vlgmr.msrb.gmra.mxu3 %vm819_vm7, %v830_v47 }
 0x382   : > { %1530 = vmatmul.msk.f32.vlgmr.msra.gmra.mxu3 %vm787_vm4, %v855_v28  ;;  %v775_v28 = vld [vmem:[#allocation11 + $0x28] sm:$0xff] }
 0x388   : > { %v969_v48 = vpop.permute.xlu1 %968 }
 0x389   : > { %1535 = vmatmul.msk.f32.vlgmr.msrb.gmra.mxu1 %vm787_vm4, %v969_v48  ;;  %v1671_v48 = vld [vmem:[%s2443_s7] ss:$0 sm:$0xff] }
 0x3fd   : > { %v851_v49 = vpop.f32.mrf.mxu3 }
 0x3fe   : > { %1533 = vmatmul.msk.f32.vlgmr.msrb.gmra.mxu0 %vm787_vm4, %v851_v49 }
 0x405   : > { %v879_v51 = vpop.f32.mrf.mxu3 }
 0x406   : > { %v882_v52 = vmul.f32 0.17677669, %v879_v51  ;;  %v993_v53 = vpop.f32.mrf.mxu1  ;;  %1539 = vmatmul.msk.f32.vlgmr.msra.gmra.mxu0 %vm787_vm4, %v1060_v50 }
 0x407   : > { %v996_v54 = vmul.f32 0.17677669, %v993_v53  ;;  %v1188_v53 = vld [vmem:[#allocation13 + $0xf0] sm:$0xff] }
 0x408   : > { %v883_v55 = vsel %vm2332_vm6, %v882_v52, -1e+09 }
 0x409   : > { %v884_v56 = vsel %vm819_vm7, %v883_v55, -inf  ;;  %v997_v57 = vsel %vm2332_vm6, %v996_v54, -1e+09  ;;  %v1189_v54 = vld [vmem:[#allocation13 + $0xf8] sm:$0xff] }
 0x40a   : > { %885 = vmax.xlane.f32.xlu2 %v884_v56  ;;  %v998_v58 = vsel %vm819_vm7, %v997_v57, -inf  ;;  %1277 = vmatpush.msrb.mxu0 %v1189_v54  ;;  %v1187_v56 = vld [vmem:[#allocation13 + $0xe8] sm:$0xff]  ;;  %v1211_v54 = vld [vmem:[#allocation14 + $0xa0] sm:$0xff] }
 0x40b   : > { %999 = vmax.xlane.f32.xlu0 %v998_v58 }
 0x40c   : > { %1278 = vmatpush.msrb.mxu0 %v1187_v56  ;;  %v1210_v56 = vld [vmem:[#allocation14 + $0x98] sm:$0xff] }
 0x47b   : > { %v2352_v59 = vpop.f32.mrf.mxu0 }
 0x47d   : > { %v886_v60 = vpop.xlane.xlu2 %885 }
 0x47e   : > { %v887_v61 = vsub.f32 %v883_v55, %v886_v60  ;;  %v1000_v62 = vpop.xlane.xlu0 %999  ;;  %v1186_v55 = vld [vmem:[#allocation13 + $0xe0] sm:$0xff]  ;;  %v1184_v60 = vld [vmem:[#allocation13 + $0xd0] sm:$0xff] }
 0x47f   : > { %v1001_v63 = vsub.f32 %v997_v57, %v1000_v62  ;;  %v1182_v62 = vld [vmem:[#allocation13 + $0xc0] sm:$0xff] }
 0x480   : > { %v888_v1 = vmul.f32 1.442695, %v887_v61  ;;  %v1185_v61 = vld [vmem:[#allocation13 + $0xd8] sm:$0xff] }
 0x481   : > { %v1002_v2 = vmul.f32 1.442695, %v1001_v63  ;;  %1279 = vmatpush.msrb.mxu0 %v1185_v61  ;;  %v1183_v63 = vld [vmem:[#allocation13 + $0xc8] sm:$0xff] }
 0x482   : > { %1683 = vpow2.f32 %v888_v1  ;;  %v1180_v1 = vld [vmem:[#allocation13 + $0xb0] sm:$0xff]  ;;  %v1673_v61 = vld [vmem:[%s2445_s9] ss:$0 sm:$0xff] }
 0x483   : > { %1685 = vpow2.f32 %v1002_v2  ;;  %v1084_v3 = vpop.f32.mrf.mxu0  ;;  %1280 = vmatpush.msrb.mxu0 %v1183_v63  ;;  %v1181_v2 = vld [vmem:[#allocation13 + $0xb8] sm:$0xff] }
 0x484   : > { %v1087_v4 = vmul.f32 0.17677669, %v1084_v3  ;;  %v1178_v3 = vld [vmem:[#allocation13 + $0xa0] sm:$0xff] }
 0x485   : > { %1281 = vmatpush.msrb.mxu0 %v1181_v2  ;;  %v1209_v2 = vld [vmem:[#allocation14 + $0x90] sm:$0xff] }
 0x486   : > { %v1088_v5 = vsel %vm2332_vm6, %v1087_v4, -1e+09  ;;  %v1179_v4 = vld [vmem:[#allocation13 + $0xa8] sm:$0xff] }
 0x487   : > { %v1089_v6 = vsel %vm819_vm7, %v1088_v5, -inf  ;;  %1282 = vmatpush.msrb.mxu0 %v1179_v4  ;;  %v1208_v4 = vld [vmem:[#allocation14 + $0x88] sm:$0xff] }
 0x488   : > { %v1684_v7 = vpop.eup %1683  ;;  %1090 = vmax.xlane.f32.xlu1 %v1089_v6  ;;  %v1177_v6 = vld [vmem:[#allocation13 + $0x98] sm:$0xff] }
 0x489   : > { %v1686_v8 = vpop.eup %1685  ;;  %v890_v9 = vsel %vm819_vm7, %v1684_v7, 0.0  ;;  %1283 = vmatpush.msrb.mxu0 %v1177_v6  ;;  %v1207_v6 = vld [vmem:[#allocation14 + $0x80] sm:$0xff] }
 0x48a   : > { %891 = vadd.xlane.f32.xlu2 %v890_v9  ;;  %v1004_v10 = vsel %vm819_vm7, %v1686_v8, 0.0  ;;  %v1172_v9 = vld [vmem:[#allocation13 + $0x70] sm:$0xff] }
 0x48b   : > { %1005 = vadd.xlane.f32.xlu0 %v1004_v10  ;;  %v1173_v10 = vld [vmem:[#allocation13 + $0x78] sm:$0xff] }
 0x49f   : > { %1009 = vrot.lane.b32.xlu0 %v2321_v22, %s2038_s24 }
 0x4a2   : > { %896 = vrot.lane.b32.xlu2 %v2321_v22, %s2039_s14  ;;  %s2484_s14 = sld [smem:[#allocation35_spill]] }
 0x4a8   : > { %s1957_s15 = scalar_lea.hbm %s2484_s14, 16 }
 0x4fb   : > { %v1091_v11 = vpop.xlane.xlu1 %1090 }
 0x4fc   : > { %v1092_v12 = vsub.f32 %v1088_v5, %v1091_v11  ;;  %v1176_v5 = vld [vmem:[#allocation13 + $0x90] sm:$0xff]  ;;  %v1170_v11 = vld [vmem:[#allocation13 + $0x60] sm:$0xff] }
 0x4fd   : > { %v892_v14 = vpop.xlane.xlu2 %891 }
 0x4fe   : > { %v1093_v15 = vmul.f32 1.442695, %v1092_v12  ;;  %1687 = vrcp.f32 %v892_v14  ;;  %v1006_v19 = vpop.xlane.xlu0 %1005  ;;  %v1171_v12 = vld [vmem:[#allocation13 + $0x68] sm:$0xff]  ;;  %v1168_v14 = vld [vmem:[#allocation13 + $0x50] sm:$0xff] }
 0x500   : > { %1689 = vpow2.f32 %v1093_v15  ;;  %v1169_v15 = vld [vmem:[#allocation13 + $0x58] sm:$0xff] }
 0x501   : > { %1691 = vrcp.f32 %v1006_v19  ;;  %v1164_v19 = vld [vmem:[#allocation13 + $0x30] sm:$0xff] }
 0x504   : > { %v1688_v17 = vpop.eup %1687 }
 0x505   : > { %v894_v18 = vmul.f32 %v1688_v17, %v1684_v7  ;;  %v897_v16 = vpop.permute.xlu2 %896  ;;  %v1174_v7 = vld [vmem:[#allocation13 + $0x80] sm:$0xff] }
 0x506   : > { %v1690_v20 = vpop.eup %1689  ;;  %917 = vmatpush.msrb.mxu3 %v897_v16  ;;  %v1166_v17 = vld [vmem:[#allocation13 + $0x40] sm:$0xff]  ;;  %v1165_v16 = vld [vmem:[#allocation13 + $0x38] sm:$0xff] }
 0x507   : > { %1531 = vmatmul.msk.f32.vlgmr.msrb.gmra.mxu3 %vm819_vm7, %v894_v18  ;;  %v1095_v21 = vsel %vm819_vm7, %v1690_v20, 0.0  ;;  %v1692_v23 = vpop.eup %1691  ;;  %v1167_v18 = vld [vmem:[#allocation13 + $0x48] sm:$0xff] }
 0x508   : > { %1096 = vadd.xlane.f32.xlu1 %v1095_v21  ;;  %v1008_v25 = vmul.f32 %v1692_v23, %v1686_v8  ;;  %937 = vmatpush.msra.mxu3 %v777_v26  ;;  %v1175_v8 = vld [vmem:[#allocation13 + $0x88] sm:$0xff]  ;;  %v1160_v23 = vld [vmem:[#allocation13 + $0x10] sm:$0xff] }
 0x509   : > { %1284 = vmatpush.msrb.mxu0 %v1175_v8  ;;  %v1163_v21 = vld [vmem:[#allocation13 + $0x28] sm:$0xff]  ;;  %v1191_v8 = vld [vmem:[#allocation14] sm:$0xff] }
 0x50a   : > { %938 = vmatpush.msra.mxu3 %v776_v27  ;;  %v1159_v26 = vld [vmem:[#allocation13 + $0x8] sm:$0xff]  ;;  %v1222_v27 = vld [vmem:[#allocation14 + $0xf8] sm:$0xff] }
 0x50b   : > { %1285 = vmatpush.msrb.mxu0 %v1173_v10 }
 0x50c   : > { %939 = vmatpush.msra.mxu3 %v775_v28  ;;  %v1221_v28 = vld [vmem:[#allocation14 + $0xf0] sm:$0xff] }
 0x50d   : > { %1286 = vmatpush.msrb.mxu0 %v1171_v12 }
 0x50e   : > { %940 = vmatpush.msra.mxu3 %v774_v29  ;;  %v1206_v29 = vld [vmem:[#allocation14 + $0x78] sm:$0xff] }
 0x50f   : > { %1287 = vmatpush.msrb.mxu0 %v1169_v15 }
 0x510   : > { %1050 = vmatpush.msrb.mxu3 %v781_v30  ;;  %v1205_v30 = vld [vmem:[#allocation14 + $0x70] sm:$0xff] }
 0x511   : > { %v1010_v24 = vpop.permute.xlu0 %1009  ;;  %1288 = vmatpush.msrb.mxu0 %v1167_v18 }
 0x512   : > { %1030 = vmatpush.msrb.mxu2 %v1010_v24  ;;  %1051 = vmatpush.msrb.mxu3 %v780_v31  ;;  %v1161_v24 = vld [vmem:[#allocation13 + $0x18] sm:$0xff]  ;;  %v1220_v31 = vld [vmem:[#allocation14 + $0xe8] sm:$0xff] }
 0x513   : > { %1536 = vmatmul.msk.f32.vlgmr.msrb.gmra.mxu2 %vm819_vm7, %v1008_v25  ;;  %1289 = vmatpush.msrb.mxu0 %v1165_v16  ;;  %v1158_v25 = vld [vmem:[#allocation13] sm:$0xff]  ;;  %v1674_v16 = vld [vmem:[%s2483_s11] ss:$0 sm:$0xff] }
 0x514   : > { %1052 = vmatpush.msrb.mxu3 %v779_v32  ;;  %1141 = vmatpush.msra.mxu2 %v785_v34 }
 0x515   : > { %1290 = vmatpush.msrb.mxu0 %v1163_v21 }
 0x516   : > { %1053 = vmatpush.msrb.mxu3 %v778_v33  ;;  %1142 = vmatpush.msra.mxu2 %v784_v40  ;;  %v1204_v33 = vld [vmem:[#allocation14 + $0x68] sm:$0xff]  ;;  %v1201_v40 = vld [vmem:[#allocation14 + $0x50] sm:$0xff] }
 0x517   : > { %1291 = vmatpush.msrb.mxu0 %v1161_v24 }
 0x518   : > { %1143 = vmatpush.msra.mxu2 %v783_v41  ;;  %v1216_v41 = vld [vmem:[#allocation14 + $0xc8] sm:$0xff] }
 0x519   : > { %1292 = vmatpush.msrb.mxu0 %v1159_v26 }
 0x51a   : > { %1144 = vmatpush.msra.mxu2 %v782_v42  ;;  %v1200_v42 = vld [vmem:[#allocation14 + $0x48] sm:$0xff] }
 0x51c   : > { %1322 = vmatpush.msrb.mxu2 %v1222_v27 }
 0x51e   : > { %1323 = vmatpush.msrb.mxu2 %v1221_v28 }
 0x520   : > { %1324 = vmatpush.msrb.mxu2 %v1220_v31 }
 0x521   : > { %1100 = vrot.lane.b32.xlu1 %v2321_v22, %s2040_s12  ;;  %s1355_s12 = scalar_lea.hbm %s2484_s14, %s1543_s21 }
 0x522   : > { %s1359_s6 = sshll.u32 %s1355_s12, 4  ;;  %s1360_s6 = int_to_ptr.hbm [resolvable:$true] %s1359_s6 }
 0x523   : > { %s1951_s10 = sshra.s32 %s1360_s6, 4  ;;  %s1952_s10 = int_to_ptr.hbm [resolvable:$true] %s1951_s10 }
 0x524   : > { %s1953_s19 = scalar_lea.hbm %s1952_s10, 8  ;;  %p1958_p7 = scmp.lt.s32.totalorder %s1952_s10, %s2484_s14 }
 0x525   : > { %p1954_p1 = scmp.ne.s32.totalorder %s1952_s10, %s1953_s19  ;;  %p1959_p9 = scmp.lt.s32.totalorder %s1957_s15, %s1953_s19 }
 0x527   : > { %p1955_p3 = pnand %p1954_p1, %p2216_p5  ;;  %p1960_p4 = por %p1959_p9, %p1958_p7 }
 0x529   : > { %p1956_p12 = pneg %p1955_p3 }
 0x52b   : > { %p1961_p8 = pnand %p1960_p4, %p1956_p12 }
 0x57b   : > { %v1097_v35 = vpop.xlane.xlu1 %1096 }
 0x57c   : > { %1693 = vrcp.f32 %v1097_v35  ;;  %v1219_v35 = vld [vmem:[#allocation14 + $0xe0] sm:$0xff] }
 0x57d   : > { %1325 = vmatpush.msrb.mxu2 %v1219_v35 }
 0x582   : > { %v1694_v36 = vpop.eup %1693 }
 0x583   : > { %v1099_v37 = vmul.f32 %v1694_v36, %v1690_v20  ;;  %v1162_v20 = vld [vmem:[#allocation13 + $0x20] sm:$0xff] }
 0x58a   : > { %v919_v22 = vpop.f32.mrf.mxu3 }
 0x58b   : > { %1532 = vmatmul.msk.f32.vlgmr.msra.gmra.mxu3 %vm787_vm4, %v919_v22  ;;  %v1203_v22 = vld [vmem:[#allocation14 + $0x60] sm:$0xff] }
 0x58c   : > { %1257 = vmatpush.msra.mxu3 %v1188_v53 }
 0x58e   : > { %1258 = vmatpush.msra.mxu3 %v1186_v55 }
 0x590   : > { %1259 = vmatpush.msra.mxu3 %v1184_v60 }
 0x592   : > { %1260 = vmatpush.msra.mxu3 %v1182_v62 }
 0x593   : > { %v1101_v38 = vpop.permute.xlu1 %1100 }
 0x594   : > { %1121 = vmatpush.msra.mxu1 %v1101_v38  ;;  %1261 = vmatpush.msra.mxu3 %v1180_v1  ;;  %v1202_v38 = vld [vmem:[#allocation14 + $0x58] sm:$0xff]  ;;  %v1196_v1 = vld [vmem:[#allocation14 + $0x28] sm:$0xff] }
 0x595   : > { %1540 = vmatmul.msk.f32.vlgmr.msra.gmra.mxu1 %vm819_vm7, %v1099_v37  ;;  %v1218_v37 = vld [vmem:[#allocation14 + $0xd8] sm:$0xff] }
 0x596   : > { %v1032_v39 = vpop.f32.mrf.mxu2  ;;  %1262 = vmatpush.msra.mxu3 %v1178_v3  ;;  %1302 = vmatpush.msrb.mxu1 %v1206_v29  ;;  %v1195_v3 = vld [vmem:[#allocation14 + $0x20] sm:$0xff] }
 0x597   : > { %1537 = vmatmul.msk.f32.vlgmr.msrb.gmra.mxu3 %vm787_vm4, %v1032_v39  ;;  %v1217_v39 = vld [vmem:[#allocation14 + $0xd0] sm:$0xff]  ;;  %1326 = vmatpush.msrb.mxu2 %v1218_v37 }
 0x598   : > { %1263 = vmatpush.msra.mxu3 %v1176_v5  ;;  %1303 = vmatpush.msrb.mxu1 %v1205_v30  ;;  %v1194_v5 = vld [vmem:[#allocation14 + $0x18] sm:$0xff] }
 0x599   : > { %1327 = vmatpush.msrb.mxu2 %v1217_v39 }
 0x59a   : > { %1264 = vmatpush.msra.mxu3 %v1174_v7  ;;  %1304 = vmatpush.msrb.mxu1 %v1204_v33  ;;  %v1192_v7 = vld [vmem:[#allocation14 + $0x8] sm:$0xff] }
 0x59b   : > { %1328 = vmatpush.msrb.mxu2 %v1216_v41 }
 0x59c   : > { %1265 = vmatpush.msra.mxu3 %v1172_v9  ;;  %1305 = vmatpush.msrb.mxu1 %v1203_v22  ;;  %v1190_v9 = vld [vmem:[%s2482_s18] sm:$0x3] }
 0x59d   : > { %v1254_v10 = vperm.slane %v1190_v9, 1  ;;  %v1253_v15 = vperm.slane %v1190_v9, 0 }
 0x59e   : > { %1266 = vmatpush.msra.mxu3 %v1170_v11  ;;  %1306 = vmatpush.msrb.mxu1 %v1202_v38 }
 0x5a0   : > { %1267 = vmatpush.msra.mxu3 %v1168_v14  ;;  %1307 = vmatpush.msrb.mxu1 %v1201_v40 }
 0x5a2   : > { %1268 = vmatpush.msra.mxu3 %v1166_v17  ;;  %1308 = vmatpush.msrb.mxu1 %v1200_v42 }
 0x5a4   : > { %1269 = vmatpush.msra.mxu3 %v1164_v19 }
 0x5a6   : > { %1270 = vmatpush.msra.mxu3 %v1162_v20 }
 0x5a8   : > { %1271 = vmatpush.msra.mxu3 %v1160_v23 }
 0x5aa   : > { %1272 = vmatpush.msra.mxu3 %v1158_v25 }
 0x60e   : > { %v942_v44 = vpop.f32.mrf.mxu3 }
 0x60f   : > { %v966_v46 = vadd.f32 %v2352_v59, %v942_v44 }
 0x612   : > { %v1123_v43 = vpop.f32.mrf.mxu1 }
 0x613   : > { %1541 = vmatmul.msk.f32.vlgmr.msra.gmra.mxu2 %vm787_vm4, %v1123_v43  ;;  %v1215_v43 = vld [vmem:[#allocation14 + $0xc0] sm:$0xff] }
 0x614   : > { %1329 = vmatpush.msrb.mxu2 %v1215_v43 }
 0x61a   : > { %v1055_v45 = vpop.f32.mrf.mxu3 }
 0x61b   : > { %v1058_v47 = vadd.f32 %v1055_v45, %v966_v46  ;;  %v1214_v45 = vld [vmem:[#allocation14 + $0xb8] sm:$0xff] }
 0x61c   : > { %1330 = vmatpush.msrb.mxu2 %v1214_v45 }
 0x696   : > { %v1146_v49 = vpop.f32.mrf.mxu2 }
 0x697   : > { %v1149_v50 = vadd.f32 %v1146_v49, %v1058_v47  ;;  %v1198_v47 = vld [vmem:[#allocation14 + $0x38] sm:$0xff] }
 0x699   : > { %v1154_v51 = vadd.f32 %v1671_v48, %v1149_v50  ;;  %v1213_v48 = vld [vmem:[#allocation14 + $0xb0] sm:$0xff] }
 0x69a   : > { %v1197_v50 = vld [vmem:[#allocation14 + $0x30] sm:$0xff]  ;;  %1331 = vmatpush.msrb.mxu2 %v1213_v48 }
 0x69b   : > { %v2377_v52 = vadd.f32 %v1154_v51, %v2301_v0  ;;  %v1212_v51 = vld [vmem:[#allocation14 + $0xa8] sm:$0xff] }
 0x69c   : > { %1332 = vmatpush.msrb.mxu2 %v1212_v51 }
 0x69d   : > { %1224 = vadd.xlane.f32.xlu2 %v2377_v52 }
 0x69e   : > { %1333 = vmatpush.msrb.mxu2 %v1211_v54 }
 0x6a0   : > { %1334 = vmatpush.msrb.mxu2 %v1210_v56 }
 0x6a2   : > { %1335 = vmatpush.msrb.mxu2 %v1209_v2 }
 0x6a4   : > { %1336 = vmatpush.msrb.mxu2 %v1208_v4 }
 0x6a6   : > { %1337 = vmatpush.msrb.mxu2 %v1207_v6 }
 0x710   : > { %v1225_v57 = vpop.xlane.xlu2 %1224 }
 0x711   : > { %v1226_v58 = vmul.f32 %v1225_v57, %v2304_v13 }
 0x713   : > { %v2382_v59 = vsub.f32 %v2377_v52, %v1226_v58  ;;  %v1672_v58 = vld [vmem:[%s2444_s8] ss:$0 sm:$0xff] }
 0x715   : > { %v1228_v0 = vmul.f32 %v2382_v59, %v2382_v59 }
 0x717   : > { %1229 = vadd.xlane.f32.xlu0 %v1228_v0 }
 0x78a   : > { %v1230_v32 = vpop.xlane.xlu0 %1229 }
 0x78b   : > { %v1231_v34 = vmul.f32 %v1230_v32, %v2304_v13  ;;  %v1199_v13 = vld [vmem:[#allocation14 + $0x40] sm:$0xff] }
 0x78c   : > { %1309 = vmatpush.msrb.mxu1 %v1199_v13 }
 0x78d   : > { %v1232_v36 = vadd.f32 1e-06, %v1231_v34 }
 0x78e   : > { %1310 = vmatpush.msrb.mxu1 %v1198_v47 }
 0x78f   : > { %1695 = vrsqrt.f32 %v1232_v36  ;;  %vm1239_vm9 = vweird.f32 %v1232_v36 }
 0x790   : > { %1311 = vmatpush.msrb.mxu1 %v1197_v50 }
 0x792   : > { %1312 = vmatpush.msrb.mxu1 %v1196_v1 }
 0x794   : > { %1313 = vmatpush.msrb.mxu1 %v1195_v3 }
 0x795   : > { %v1696_v44 = vpop.eup %1695 }
 0x796   : > { %v1234_v46 = vmul.f32 %v1696_v44, %v1232_v36  ;;  %vm1240_vm8 = vweird.f32 %v1696_v44  ;;  %1314 = vmatpush.msrb.mxu1 %v1194_v5 }
 0x797   : > { %vm1241_vm10 = vmor %vm1239_vm9, %vm1240_vm8 }
 0x798   : > { %v1235_v49 = vmul.f32 %v1696_v44, %v1234_v46 }
 0x79a   : > { %v1236_v53 = vmul.f32 0.5, %v1235_v49 }
 0x79c   : > { %v1237_v55 = vsub.f32 1.5, %v1236_v53 }
 0x79e   : > { %v1238_v57 = vmul.f32 %v1696_v44, %v1237_v55 }
 0x7a0   : > { %v1242_v0 = vsel %vm1241_vm10, %v1696_v44, %v1238_v57 }
 0x7a1   : > { %v1243_v60 = vmul.f32 %v1242_v0, %v2382_v59  ;;  %v1193_v59 = vld [vmem:[#allocation14 + $0x10] sm:$0xff] }
 0x7a2   : > { %1315 = vmatpush.msrb.mxu1 %v1193_v59 }
 0x7a3   : > { %v1247_v62 = vmul.f32 %v1672_v58, %v1243_v60 }
 0x7a4   : > { %1316 = vmatpush.msrb.mxu1 %v1192_v7 }
 0x7a5   : > { %v1251_v63 = vadd.f32 %v1673_v61, %v1247_v62 }
 0x7a6   : > { %1317 = vmatpush.msrb.mxu1 %v1191_v8 }
 0x7a7   : > { %1273 = vmatmul.f32.vlgmr.msra.gmra.mxu3 %v1251_v63  ;;  %1293 = vmatmul.f32.vlgmr.msrb.gmra.mxu0 %v1251_v63 }
 0x824   : > { %v1294_v11 = vpop.f32.mrf.mxu0 }
 0x825   : > { %v1295_v12 = vadd.f32 %v1294_v11, %v1254_v10 }
 0x827   : > { %v1298_v14 = vmax.f32 %v1295_v12, 0.0 }
 0x829   : > { %1338 = vmatmul.f32.vlgmr.msrb.gmra.mxu2 %v1298_v14 }
 0x82a   : > { %v1274_v17 = vpop.f32.mrf.mxu3 }
 0x82b   : > { %v1275_v18 = vadd.f32 %v1274_v17, %v1253_v15 }
 0x82d   : > { %v1297_v19 = vmax.f32 %v1275_v18, 0.0 }
 0x82f   : > { %1318 = vmatmul.f32.vlgmr.msrb.gmra.mxu1 %v1297_v19 }
 0x8ac   : > { %v1319_v20 = vpop.f32.mrf.mxu1  ;;  %v1339_v23 = vpop.f32.mrf.mxu2 }
 0x8ad   : > { %v1320_v21 = vadd.f32 %v1674_v16, %v1319_v20 }
 0x8af   : > { %v1340_v24 = vadd.f32 %v1339_v23, %v1320_v21 }
 0x8b1   : > { %v1342_v25 = vadd.f32 %v1340_v24, %v2377_v52 }
 0x8b3   : > { %1343 = vst [vmem:[%s614_s3] sm:$0xff] %v1342_v25 }
 0x8b4   : > { %1964 = shalt.err (!%p1961_p8)
}
 0x8b5   : > { %1574 = dma.vmem_to_hbm [thread:$0]  (%p2216_p5), %s1358_s25, 128, %s1360_s6, %s1345_s20  }
 0x8b6 PF: > { %s1371_s4 = sand.u32 1, %s2011_s29   ;;  %p2485_p10 = scmp.ge.s32.totalorder %s2023_s16, 2 }
 0x8b7   : > { %s1372_s21 = scalar_lea.sflag [#allocation4], %s1371_s4 }
 0x8b8   : > { %p1603_p13 = pnand %p2485_p10, %p2220_p6 }
 0x8ba   : > { %p1604_p11 = pneg %p1603_p13 }
 0x8bc   : > { %2006 = dma.done.wait (%p1604_p11), %s1372_s21, 128  }
 0x8bd   : > { %2008 = vsyncadd (%p1604_p11), %s1372_s21, 4294967168  ;;  %s2486_s16 = sld [smem:[#allocation25_spill]]  ;;  %s2489_s29 = smov %s2015_s30 }
 0x8be   : > { %s2487_s23 = sld [smem:[#allocation24_spill]] }
 0x8bf   : > { %s2488_s15 = sld [smem:[#allocation26_spill]] }
 0x8c3   : > { %p33_p0 = scmp.ge.s32.totalorder %s2486_s16, 4  }
 0x8c4   : > { %s2490_s30 = smov %s2487_s23 }
 0x8c5   :  { %35 = sbr.rel (!%p33_p0) target bundleno = 20 (0x14), region = 158 }
 0x8ca   :  { %1378 = vsyncpa [#allocation3], 1 }
 0x8cb   :  { %1380 = vsyncpa [#allocation3 + $0x1], 1 }
 0x8cc   :  { %1381 = vsyncpa [#allocation6], 1 }
 0x8cd   :  { %1383 = vsyncpa [#allocation6 + $0x1], 1 }
 0x8ce   :  { %1384 = vsyncpa [#allocation9], 1 }
 0x8cf   :  { %1385 = vsyncpa [#allocation12], 1 }
 0x8d0   :  { %1386 = vsyncpa [#allocation15], 1 }
 0x8d1   :  { %1387 = vsyncpa [#allocation4], 1 }
 0x8d2   :  { %1389 = vsyncpa [#allocation4 + $0x1], 1 }

</bundles_post_ra>
